<compile_context>
chip_gen: v7x
topology: tpu7x:2x2x1
jax: 0.10.0
libtpu: 0.0.40
codegen_flags: <defaults>
</compile_context>

<pallas_src>
import functools
import math

import jax
import jax.numpy as jnp
from jax.experimental import pallas as pl
from jax.experimental.pallas import tpu as pltpu


def _gcn_kernel(alpha_ref, adj_ref, x_ref, wt_ref, out_ref, acc_ref, *,
                lb1, tk, num_k, x_swapped, adj_has_d0, adj_has_d1,
                compute_dtype):
    """One (d0-group, d1-group, row-tile, k-tile) step of PReLU((A @ X) @ Wt).

    Kernel-visible shapes:
      adj_ref : (LA0, LA1, tm, tk)   LA0 in {1, LB0}, LA1 in {1, LB1}
      x_ref   : (LB1, LB0, M, C) if x_swapped else (LB0, LB1, M, C)  (resident)
      wt_ref  : (C, E)  float32
      out_ref : (LB0, LB1, tm, E)  float32
      acc_ref : (LB0, LB1, tm, C)  float32 scratch, carried across the K axis
    """
    k = pl.program_id(3)

    @pl.when(k == 0)
    def _init():
        acc_ref[...] = jnp.zeros_like(acc_ref)

    # K-slice of the resident feature panel (the panel is DMA'd once per
    # batch group; only the needed K chunk is touched per step).
    if num_k == 1:
        x_k = x_ref[...]
    else:
        koff = pl.multiple_of(k * tk, tk)
        x_k = x_ref[:, :, pl.ds(koff, tk), :]

    # Stream adjacency in its stored dtype; cast to bf16 on-chip (VPU slack).
    adj = adj_ref[...].astype(compute_dtype)

    parts = []
    for b in range(lb1):                                     # unrolled, lb1 <= 8
        x_b = x_k[b] if x_swapped else x_k[:, b]             # (LB0, tk, C)
        a_b = adj[:, b if adj_has_d1 else 0]                 # (LA0, tm, tk)
        if adj_has_d0:
            p = jnp.einsum("lik,lkc->lic", a_b, x_b,
                           preferred_element_type=jnp.float32)
        else:  # adjacency broadcast over the D0 batch axis
            p = jnp.einsum("ik,lkc->lic", a_b[0], x_b,
                           preferred_element_type=jnp.float32)
        parts.append(p)
    acc_ref[...] += jnp.stack(parts, axis=1)                 # (LB0, LB1, tm, C)

    @pl.when(k == pl.num_programs(3) - 1)
    def _finalize():
        lb0, lb1_, tm, c = acc_ref.shape
        e = wt_ref.shape[-1]
        # Linear (no bias) on the f32 aggregate; all batch rows fused into one
        # (LB0*LB1*tm, C) @ (C, E) MXU call.  PReLU epilogue in f32.
        agg = acc_ref[...].reshape(lb0 * lb1_ * tm, c)
        feat = jnp.dot(agg, wt_ref[...], preferred_element_type=jnp.float32)
        alpha = alpha_ref[0]
        feat = jnp.where(feat > 0, feat, alpha * feat)
        out_ref[...] = feat.reshape(lb0, lb1_, tm, e).astype(out_ref.dtype)


def _pick_tile(dim, target, align):
    """Largest divisor of `dim` <= target that is a multiple of `align`;
    falls back to the full dim (always a legal block extent)."""
    if dim <= target:
        return dim
    for t in range(min(target, dim), 0, -1):
        if dim % t == 0 and t % align == 0:
            return t
    return dim


def _largest_divisor_leq(n, limit):
    for d in range(max(1, min(n, limit)), 0, -1):
        if n % d == 0:
            return d
    return 1


def graph_convolution(x, adjacency, weight_t, alpha, *, x_batch_swapped=False,
                      compute_dtype=jnp.bfloat16):
    """Batched GCN: PReLU((adjacency @ x) @ weight_t).

    x:          (D1, D0, M, C) if x_batch_swapped else (D0, D1, M, C)
                (the swapped case folds a (D0,D1) batch permute into the
                 kernel's index_map instead of relayouting in HBM).
    adjacency:  (A0, A1, M, M) with A0 in {1, D0}, A1 in {1, D1} (broadcast
                batch axes are handled in the index_map, not materialized).
    weight_t:   (C, E)  pre-transposed nn.Linear weight (W.T).
    alpha:      scalar  PReLU slope.
    Returns (D0, D1, M, E) float32.
    """
    if x_batch_swapped:
        d1, d0, m, c = x.shape
    else:
        d0, d1, m, c = x.shape
    e = weight_t.shape[-1]

    if x.dtype != compute_dtype:
        x = x.astype(compute_dtype)          # no-op when the caller pre-casts

    if adjacency.ndim < 4:
        adjacency = adjacency.reshape((1,) * (4 - adjacency.ndim) + adjacency.shape)
    if adjacency.shape[-2:] != (m, m):
        raise ValueError("adjacency last two dims must be (M, M)")
    a0, a1 = adjacency.shape[0], adjacency.shape[1]
    if a0 not in (1, d0) or a1 not in (1, d1):
        adjacency = jnp.broadcast_to(adjacency, (d0, d1, m, m))  # rare fallback
        a0, a1 = d0, d1
    adj_has_d0, adj_has_d1 = (a0 == d0), (a1 == d1)

    alpha = jnp.asarray(alpha, jnp.float32).reshape(1)
    weight_t = jnp.asarray(weight_t, jnp.float32)

    # ----------------------------- tiling -----------------------------------
    tm = _pick_tile(m, 512, 8)       # row tile (sublane aligned)
    tk = _pick_tile(m, 512, 128)     # aggregation K tile (lane aligned)
    num_i, num_k = m // tm, m // tk

    x_item = jnp.dtype(compute_dtype).itemsize
    a_item = adjacency.dtype.itemsize

    try:
        vmem_cap = int(pltpu.get_tpu_info().vmem_capacity_bytes)
    except Exception:  # pragma: no cover - conservative default (v7x = 64 MiB)
        vmem_cap = 64 << 20
    block_budget = min(vmem_cap // 4, 16 << 20)

    lb1 = _largest_divisor_leq(d1, 8)     # unrolled in-kernel batch loop

    def vmem_need(lb0, lb1_):
        adj_blk = ((lb0 if adj_has_d0 else 1) * (lb1_ if adj_has_d1 else 1)
                   * tm * tk * a_item)
        x_blk = lb0 * lb1_ * m * c * x_item
        out_blk = lb0 * lb1_ * tm * e * 4
        acc_blk = lb0 * lb1_ * tm * c * 4
        wt_blk = c * e * 4
        return 2 * (adj_blk + x_blk + out_blk + wt_blk) + acc_blk + (1 << 20)

    lb0 = 1
    for cand in range(d0, 0, -1):
        if d0 % cand == 0 and vmem_need(cand, lb1) <= block_budget:
            lb0 = cand
            break
    while lb1 > 1 and vmem_need(lb0, lb1) > block_budget:
        lb1 = _largest_divisor_leq(d1, lb1 - 1)

    grid = (d0 // lb0, d1 // lb1, num_i, num_k)

    ab0 = lb0 if adj_has_d0 else 1
    ab1 = lb1 if adj_has_d1 else 1
    adj_index = lambda g0, g1, i, k: (g0 if adj_has_d0 else 0,
                                      g1 if adj_has_d1 else 0, i, k)
    if x_batch_swapped:
        x_block = (lb1, lb0, m, c)
        x_index = lambda g0, g1, i, k: (g1, g0, 0, 0)
    else:
        x_block = (lb0, lb1, m, c)
        x_index = lambda g0, g1, i, k: (g0, g1, 0, 0)

    vmem_limit = int(min(max(2 * vmem_need(lb0, lb1), 16 << 20), vmem_cap // 2))

    cost = pl.CostEstimate(
        flops=2 * d0 * d1 * m * m * c + 2 * d0 * d1 * m * c * e,
        transcendentals=0,
        bytes_accessed=(adjacency.size * a_item + x.size * x_item
                        + c * e * 4 + d0 * d1 * m * e * 4),
    )

    kernel = functools.partial(
        _gcn_kernel, lb1=lb1, tk=tk, num_k=num_k, x_swapped=x_batch_swapped,
        adj_has_d0=adj_has_d0, adj_has_d1=adj_has_d1, compute_dtype=compute_dtype)

    out = pl.pallas_call(
        kernel,
        out_shape=jax.ShapeDtypeStruct((d0, d1, m, e), jnp.float32),
        grid=grid,
        in_specs=[
            pl.BlockSpec(memory_space=pltpu.SMEM),                    # PReLU alpha
            pl.BlockSpec((ab0, ab1, tm, tk), adj_index),              # adjacency
            pl.BlockSpec(x_block, x_index),                           # features (resident panel)
            pl.BlockSpec((c, e), lambda g0, g1, i, k: (0, 0)),        # W^T
        ],
        out_specs=pl.BlockSpec((lb0, lb1, tm, e),
                               lambda g0, g1, i, k: (g0, g1, i, 0)),
        scratch_shapes=[pltpu.VMEM((lb0, lb1, tm, c), jnp.float32)],
        compiler_params=pltpu.CompilerParams(
            dimension_semantics=("parallel", "parallel", "parallel", "arbitrary"),
            vmem_limit_bytes=vmem_limit,
        ),
        cost_estimate=cost,
    )(alpha, adjacency, x, weight_t)

    return out


def sparse_graph_convolution(graph, spatial_adj, temporal_adj, params,
                             *, compute_dtype=jnp.bfloat16):
    """Forward pass of SparseGraphConvolution.

    graph:        (B, T, N, C+1); the first feature channel is dropped.
    spatial_adj:  broadcastable to (T, B, N, N)
    temporal_adj: broadcastable to (N, B, T, T)
    Returns (gcn_spatial_features, gcn_temporal_features), each (N, B, T, E).
    """
    # Channel drop + bf16 cast fused into a single XLA pass.
    g = graph[..., 1:].astype(compute_dtype)            # (B, T, N, C)

    # Spatial branch: the (B,T)->(T,B) permute is pure batch-axis reordering
    # and is folded into the kernel's index_map (no HBM relayout).
    spa_feat = graph_convolution(g, spatial_adj, params["w_spatial_t"],
                                 params["alpha_spatial"],
                                 x_batch_swapped=True,
                                 compute_dtype=compute_dtype)   # (T, B, N, E)
    spa_feat = jnp.transpose(spa_feat, (2, 1, 0, 3))            # (N, B, T, E)

    # Temporal branch: (B,T,N,C)->(N,B,T,C) changes minor-dim order (real
    # relayout) -> do it once in XLA on the bf16 tensor.
    tem = jnp.transpose(g, (2, 0, 1, 3))                        # (N, B, T, C)
    tem_feat = graph_convolution(tem, temporal_adj, params["w_temporal_t"],
                                 params["alpha_temporal"],
                                 x_batch_swapped=False,
                                 compute_dtype=compute_dtype)   # (N, B, T, E)
    return spa_feat, tem_feat


# ----------------------------- pure-JAX reference -----------------------------

def _gcn_reference(x, adjacency, weight_t, alpha, compute_dtype):
    a_c = adjacency.astype(compute_dtype)
    x_c = x.astype(compute_dtype)
    agg = jnp.einsum("...ij,...jc->...ic", a_c, x_c,
                     preferred_element_type=jnp.float32)
    feat = jnp.einsum("...ic,ce->...ie", agg, weight_t.astype(jnp.float32),
                      preferred_element_type=jnp.float32,
                      precision=jax.lax.Precision.HIGHEST)
    alpha = jnp.asarray(alpha, jnp.float32)
    return jnp.where(feat > 0, feat, alpha * feat)


def sparse_graph_convolution_reference(graph, spatial_adj, temporal_adj, params,
                                       compute_dtype=jnp.bfloat16):
    g = graph[..., 1:]
    spa = jnp.transpose(g, (1, 0, 2, 3))
    tem = jnp.transpose(spa, (2, 1, 0, 3))
    s = _gcn_reference(spa, spatial_adj, params["w_spatial_t"],
                       params["alpha_spatial"], compute_dtype)
    s = jnp.transpose(s, (2, 1, 0, 3))
    t = _gcn_reference(tem, temporal_adj, params["w_temporal_t"],
                       params["alpha_temporal"], compute_dtype)
    return s, t


if __name__ == "__main__":
    key = jax.random.PRNGKey(0)
    kg, ka1, ka2, kw1, kw2 = jax.random.split(key, 5)

    B, T, N = 2, 8, 16
    IN_DIMS, EMB = 16, 16                      # module defaults
    D = IN_DIMS + 1                            # first channel is sliced off

    graph = jax.random.normal(kg, (B, T, N, D), dtype=jnp.float32)
    spatial_adj = jax.random.uniform(ka1, (T, B, N, N), dtype=jnp.float32) / N
    temporal_adj = jax.random.uniform(ka2, (N, B, T, T), dtype=jnp.float32) / T

    # nn.Linear(in, out, bias=False) weights (PyTorch layout (out, in)), pre-transposed.
    w_spatial = jax.random.normal(kw1, (EMB, IN_DIMS), jnp.float32) / math.sqrt(IN_DIMS)
    w_temporal = jax.random.normal(kw2, (EMB, IN_DIMS), jnp.float32) / math.sqrt(IN_DIMS)
    params = {
        "w_spatial_t": w_spatial.T,
        "w_temporal_t": w_temporal.T,
        "alpha_spatial": jnp.float32(0.25),    # nn.PReLU() default init
        "alpha_temporal": jnp.float32(0.25),
    }

    fwd = jax.jit(sparse_graph_convolution)
    spa_out, tem_out = fwd(graph, spatial_adj, temporal_adj, params)
    jax.block_until_ready((spa_out, tem_out))

    spa_ref, tem_ref = sparse_graph_convolution_reference(graph, spatial_adj,
                                                          temporal_adj, params)
    assert spa_out.shape == (N, B, T, EMB)
    assert tem_out.shape == (N, B, T, EMB)
    assert jnp.allclose(spa_out, spa_ref, atol=1e-2, rtol=1e-2)
    assert jnp.allclose(tem_out, tem_ref, atol=1e-2, rtol=1e-2)

    print("KERNEL_OK")
</pallas_src>

<mosaic_0001>
module attributes {stable_mosaic.version = 11 : i64} {
  func.func @_gcn_kernel(%arg0: i32, %arg1: i32, %arg2: i32, %arg3: i32, %arg4: memref<1xf32, #tpu.memory_space<smem>>, %arg5: memref<8x2x16x16xf32, #tpu.memory_space<vmem>>, %arg6: memref<2x8x16x16xbf16, #tpu.memory_space<vmem>>, %arg7: memref<16x16xf32, #tpu.memory_space<vmem>>, %arg8: memref<8x2x16x16xf32, #tpu.memory_space<vmem>>, %arg9: memref<8x2x16x16xf32, #tpu.memory_space<vmem>>) attributes {dimension_semantics = [#tpu.dimension_semantics<parallel>, #tpu.dimension_semantics<parallel>, #tpu.dimension_semantics<parallel>, #tpu.dimension_semantics<arbitrary>], iteration_bounds = array<i64: 1, 1, 1, 1>, scalar_prefetch = 0 : i64, scratch_operands = 1 : i64, tpu.core_type = #tpu.core_type<tc>, window_params = [{transform_indices = @transform_0, window_bounds = array<i64: 1>}, {transform_indices = @transform_1, window_bounds = array<i64: 8, 2, 16, 16>}, {transform_indices = @transform_2, window_bounds = array<i64: 2, 8, 16, 16>}, {pipeline_mode = #tpu.pipeline_mode<synchronous>, transform_indices = @transform_3, window_bounds = array<i64: 16, 16>}, {transform_indices = @transform_4, window_bounds = array<i64: 8, 2, 16, 16>}]} {
    %c0_i32 = arith.constant 0 : i32
    %0 = arith.cmpi eq, %arg3, %c0_i32 : i32
    %1 = arith.extui %0 : i1 to i32
    %c0_i32_0 = arith.constant 0 : i32
    %2 = arith.cmpi ne, %1, %c0_i32_0 : i32
    scf.if %2 {
      %cst_19 = arith.constant 0.000000e+00 : f32
      %25 = vector.broadcast %cst_19 : f32 to vector<8x2x16x16xf32>
      %c0_20 = arith.constant 0 : index
      %c0_21 = arith.constant 0 : index
      %c0_22 = arith.constant 0 : index
      %c0_23 = arith.constant 0 : index
      %26 = vector.load %arg9[%c0_20, %c0_21, %c0_22, %c0_23] : memref<8x2x16x16xf32, #tpu.memory_space<vmem>>, vector<8x2x16x16xf32>
      tpu.vector_store %arg9[%c0_20, %c0_21, %c0_22, %c0_23], %25 {strides = array<i32>} : memref<8x2x16x16xf32, #tpu.memory_space<vmem>>, vector<8x2x16x16xf32>,
    } else {
    }
    %c0 = arith.constant 0 : index
    %c0_1 = arith.constant 0 : index
    %c0_2 = arith.constant 0 : index
    %c0_3 = arith.constant 0 : index
    %3 = vector.load %arg6[%c0, %c0_1, %c0_2, %c0_3] : memref<2x8x16x16xbf16, #tpu.memory_space<vmem>>, vector<2x8x16x16xbf16>
    %c0_4 = arith.constant 0 : index
    %c0_5 = arith.constant 0 : index
    %c0_6 = arith.constant 0 : index
    %c0_7 = arith.constant 0 : index
    %4 = vector.load %arg5[%c0_4, %c0_5, %c0_6, %c0_7] : memref<8x2x16x16xf32, #tpu.memory_space<vmem>>, vector<8x2x16x16xf32>
    %5 = arith.truncf %4 : vector<8x2x16x16xf32> to vector<8x2x16x16xbf16>
    %6 = vector.extract_strided_slice %3 {offsets = [0, 0, 0, 0], sizes = [1, 8, 16, 16], strides = [1, 1, 1, 1]} : vector<2x8x16x16xbf16> to vector<1x8x16x16xbf16>
    %7 = vector.shape_cast %6 : vector<1x8x16x16xbf16> to vector<8x16x16xbf16>
    %8 = vector.extract_strided_slice %5 {offsets = [0, 0, 0, 0], sizes = [8, 1, 16, 16], strides = [1, 1, 1, 1]} : vector<8x2x16x16xbf16> to vector<8x1x16x16xbf16>
    %9 = vector.shape_cast %8 : vector<8x1x16x16xbf16> to vector<8x16x16xbf16>
    "tpu.trace_start"() <{level = 10 : i32, message = "lik,lkc->lic"}> : () -> ()
    %cst = arith.constant dense<0.000000e+00> : vector<8x16x16xf32>
    %10 = tpu.matmul %9, %7, %cst {dimension_numbers = #tpu.dot_dimension_numbers<[2], [1], [1], [2], [0, 0, 0, 1, 1, 2], [0], [0]>} : vector<8x16x16xbf16>, vector<8x16x16xbf16>, vector<8x16x16xf32> -> vector<8x16x16xf32>
    "tpu.trace_stop"() : () -> ()
    %11 = vector.extract_strided_slice %3 {offsets = [1, 0, 0, 0], sizes = [1, 8, 16, 16], strides = [1, 1, 1, 1]} : vector<2x8x16x16xbf16> to vector<1x8x16x16xbf16>
    %12 = vector.shape_cast %11 : vector<1x8x16x16xbf16> to vector<8x16x16xbf16>
    %13 = vector.extract_strided_slice %5 {offsets = [0, 1, 0, 0], sizes = [8, 1, 16, 16], strides = [1, 1, 1, 1]} : vector<8x2x16x16xbf16> to vector<8x1x16x16xbf16>
    %14 = vector.shape_cast %13 : vector<8x1x16x16xbf16> to vector<8x16x16xbf16>
    "tpu.trace_start"() <{level = 10 : i32, message = "lik,lkc->lic"}> : () -> ()
    %cst_8 = arith.constant dense<0.000000e+00> : vector<8x16x16xf32>
    %15 = tpu.matmul %14, %12, %cst_8 {dimension_numbers = #tpu.dot_dimension_numbers<[2], [1], [1], [2], [0, 0, 0, 1, 1, 2], [0], [0]>} : vector<8x16x16xbf16>, vector<8x16x16xbf16>, vector<8x16x16xf32> -> vector<8x16x16xf32>
    "tpu.trace_stop"() : () -> ()
    %c0_9 = arith.constant 0 : index
    %c0_10 = arith.constant 0 : index
    %c0_11 = arith.constant 0 : index
    %c0_12 = arith.constant 0 : index
    %16 = vector.load %arg9[%c0_9, %c0_10, %c0_11, %c0_12] : memref<8x2x16x16xf32, #tpu.memory_space<vmem>>, vector<8x2x16x16xf32>
    %17 = vector.shape_cast %10 : vector<8x16x16xf32> to vector<8x1x16x16xf32>
    %18 = vector.shape_cast %15 : vector<8x16x16xf32> to vector<8x1x16x16xf32>
    %19 = tpu.concatenate %17, %18 in 1 : vector<8x1x16x16xf32>, vector<8x1x16x16xf32> -> vector<8x2x16x16xf32>
    %20 = arith.addf %16, %19 : vector<8x2x16x16xf32>
    %c0_13 = arith.constant 0 : index
    %c0_14 = arith.constant 0 : index
    %c0_15 = arith.constant 0 : index
    %c0_16 = arith.constant 0 : index
    %21 = vector.load %arg9[%c0_13, %c0_14, %c0_15, %c0_16] : memref<8x2x16x16xf32, #tpu.memory_space<vmem>>, vector<8x2x16x16xf32>
    tpu.vector_store %arg9[%c0_13, %c0_14, %c0_15, %c0_16], %20 {strides = array<i32>} : memref<8x2x16x16xf32, #tpu.memory_space<vmem>>, vector<8x2x16x16xf32>,
    %c0_i32_17 = arith.constant 0 : i32
    %22 = arith.cmpi eq, %arg3, %c0_i32_17 : i32
    %23 = arith.extui %22 : i1 to i32
    %c0_i32_18 = arith.constant 0 : i32
    %24 = arith.cmpi ne, %23, %c0_i32_18 : i32
    scf.if %24 {
      %c0_19 = arith.constant 0 : index
      %c0_20 = arith.constant 0 : index
      %c0_21 = arith.constant 0 : index
      %c0_22 = arith.constant 0 : index
      %25 = vector.load %arg9[%c0_19, %c0_20, %c0_21, %c0_22] : memref<8x2x16x16xf32, #tpu.memory_space<vmem>>, vector<8x2x16x16xf32>
      %26 = vector.shape_cast %25 : vector<8x2x16x16xf32> to vector<256x16xf32>
      %c0_23 = arith.constant 0 : index
      %c0_24 = arith.constant 0 : index
      %27 = vector.load %arg7[%c0_23, %c0_24] : memref<16x16xf32, #tpu.memory_space<vmem>>, vector<16x16xf32>
      %cst_25 = arith.constant dense<0.000000e+00> : vector<256x16xf32>
      %28 = tpu.matmul %26, %27, %cst_25 {dimension_numbers = #tpu.dot_dimension_numbers<[1], [0], [0], [1], [0, 0, 1, 1], [], []>} : vector<256x16xf32>, vector<16x16xf32>, vector<256x16xf32> -> vector<256x16xf32>
      %c0_26 = arith.constant 0 : index
      %29 = memref.load %arg4[%c0_26] : memref<1xf32, #tpu.memory_space<smem>>
      %cst_27 = arith.constant 0.000000e+00 : f32
      %30 = vector.broadcast %cst_27 : f32 to vector<256x16xf32>
      %31 = arith.cmpf ogt, %28, %30 : vector<256x16xf32>
      %32 = vector.broadcast %29 : f32 to vector<256x16xf32>
      %33 = arith.mulf %32, %28 : vector<256x16xf32>
      %34 = arith.select %31, %28, %33 : vector<256x16xi1>, vector<256x16xf32>
      %35 = vector.shape_cast %34 : vector<256x16xf32> to vector<8x2x16x16xf32>
      %c0_28 = arith.constant 0 : index
      %c0_29 = arith.constant 0 : index
      %c0_30 = arith.constant 0 : index
      %c0_31 = arith.constant 0 : index
      %36 = vector.load %arg8[%c0_28, %c0_29, %c0_30, %c0_31] : memref<8x2x16x16xf32, #tpu.memory_space<vmem>>, vector<8x2x16x16xf32>
      tpu.vector_store %arg8[%c0_28, %c0_29, %c0_30, %c0_31], %35 {strides = array<i32>} : memref<8x2x16x16xf32, #tpu.memory_space<vmem>>, vector<8x2x16x16xf32>,
    } else {
    }
    return
  }
  func.func @transform_0(%arg0: i32, %arg1: i32, %arg2: i32, %arg3: i32) -> i32 {
    %c0_i32 = arith.constant 0 : i32
    %c0_i32_0 = arith.constant 0 : i32
    return %c0_i32 : i32
  }
  func.func @transform_1(%arg0: i32, %arg1: i32, %arg2: i32, %arg3: i32) -> (i32, i32, i32, i32) {
    %c0_i32 = arith.constant 0 : i32
    return %arg0, %arg1, %arg2, %arg3 : i32, i32, i32, i32
  }
  func.func @transform_2(%arg0: i32, %arg1: i32, %arg2: i32, %arg3: i32) -> (i32, i32, i32, i32) {
    %c0_i32 = arith.constant 0 : i32
    %c0_i32_0 = arith.constant 0 : i32
    %c0_i32_1 = arith.constant 0 : i32
    return %arg1, %arg0, %c0_i32, %c0_i32_0 : i32, i32, i32, i32
  }
  func.func @transform_3(%arg0: i32, %arg1: i32, %arg2: i32, %arg3: i32) -> (i32, i32) {
    %c0_i32 = arith.constant 0 : i32
    %c0_i32_0 = arith.constant 0 : i32
    %c0_i32_1 = arith.constant 0 : i32
    return %c0_i32, %c0_i32_0 : i32, i32
  }
  func.func @transform_4(%arg0: i32, %arg1: i32, %arg2: i32, %arg3: i32) -> (i32, i32, i32, i32) {
    %c0_i32 = arith.constant 0 : i32
    %c0_i32_0 = arith.constant 0 : i32
    return %arg0, %arg1, %arg2, %c0_i32 : i32, i32, i32, i32
  }
}

module attributes {stable_mosaic.version = 11 : i64} {
  func.func @_gcn_kernel(%arg0: i32, %arg1: i32, %arg2: i32, %arg3: i32, %arg4: memref<1xf32, #tpu.memory_space<smem>>, %arg5: memref<16x2x8x8xf32, #tpu.memory_space<vmem>>, %arg6: memref<16x2x8x16xbf16, #tpu.memory_space<vmem>>, %arg7: memref<16x16xf32, #tpu.memory_space<vmem>>, %arg8: memref<16x2x8x16xf32, #tpu.memory_space<vmem>>, %arg9: memref<16x2x8x16xf32, #tpu.memory_space<vmem>>) attributes {dimension_semantics = [#tpu.dimension_semantics<parallel>, #tpu.dimension_semantics<parallel>, #tpu.dimension_semantics<parallel>, #tpu.dimension_semantics<arbitrary>], iteration_bounds = array<i64: 1, 1, 1, 1>, scalar_prefetch = 0 : i64, scratch_operands = 1 : i64, tpu.core_type = #tpu.core_type<tc>, window_params = [{transform_indices = @transform_0, window_bounds = array<i64: 1>}, {transform_indices = @transform_1, window_bounds = array<i64: 16, 2, 8, 8>}, {transform_indices = @transform_2, window_bounds = array<i64: 16, 2, 8, 16>}, {pipeline_mode = #tpu.pipeline_mode<synchronous>, transform_indices = @transform_3, window_bounds = array<i64: 16, 16>}, {transform_indices = @transform_4, window_bounds = array<i64: 16, 2, 8, 16>}]} {
    %c0_i32 = arith.constant 0 : i32
    %0 = arith.cmpi eq, %arg3, %c0_i32 : i32
    %1 = arith.extui %0 : i1 to i32
    %c0_i32_0 = arith.constant 0 : i32
    %2 = arith.cmpi ne, %1, %c0_i32_0 : i32
    scf.if %2 {
      %cst_19 = arith.constant 0.000000e+00 : f32
      %25 = vector.broadcast %cst_19 : f32 to vector<16x2x8x16xf32>
      %c0_20 = arith.constant 0 : index
      %c0_21 = arith.constant 0 : index
      %c0_22 = arith.constant 0 : index
      %c0_23 = arith.constant 0 : index
      %26 = vector.load %arg9[%c0_20, %c0_21, %c0_22, %c0_23] : memref<16x2x8x16xf32, #tpu.memory_space<vmem>>, vector<16x2x8x16xf32>
      tpu.vector_store %arg9[%c0_20, %c0_21, %c0_22, %c0_23], %25 {strides = array<i32>} : memref<16x2x8x16xf32, #tpu.memory_space<vmem>>, vector<16x2x8x16xf32>,
    } else {
    }
    %c0 = arith.constant 0 : index
    %c0_1 = arith.constant 0 : index
    %c0_2 = arith.constant 0 : index
    %c0_3 = arith.constant 0 : index
    %3 = vector.load %arg6[%c0, %c0_1, %c0_2, %c0_3] : memref<16x2x8x16xbf16, #tpu.memory_space<vmem>>, vector<16x2x8x16xbf16>
    %c0_4 = arith.constant 0 : index
    %c0_5 = arith.constant 0 : index
    %c0_6 = arith.constant 0 : index
    %c0_7 = arith.constant 0 : index
    %4 = vector.load %arg5[%c0_4, %c0_5, %c0_6, %c0_7] : memref<16x2x8x8xf32, #tpu.memory_space<vmem>>, vector<16x2x8x8xf32>
    %5 = arith.truncf %4 : vector<16x2x8x8xf32> to vector<16x2x8x8xbf16>
    %6 = vector.extract_strided_slice %3 {offsets = [0, 0, 0, 0], sizes = [16, 1, 8, 16], strides = [1, 1, 1, 1]} : vector<16x2x8x16xbf16> to vector<16x1x8x16xbf16>
    %7 = vector.shape_cast %6 : vector<16x1x8x16xbf16> to vector<16x8x16xbf16>
    %8 = vector.extract_strided_slice %5 {offsets = [0, 0, 0, 0], sizes = [16, 1, 8, 8], strides = [1, 1, 1, 1]} : vector<16x2x8x8xbf16> to vector<16x1x8x8xbf16>
    %9 = vector.shape_cast %8 : vector<16x1x8x8xbf16> to vector<16x8x8xbf16>
    "tpu.trace_start"() <{level = 10 : i32, message = "lik,lkc->lic"}> : () -> ()
    %cst = arith.constant dense<0.000000e+00> : vector<16x8x16xf32>
    %10 = tpu.matmul %9, %7, %cst {dimension_numbers = #tpu.dot_dimension_numbers<[2], [1], [1], [2], [0, 0, 0, 1, 1, 2], [0], [0]>} : vector<16x8x8xbf16>, vector<16x8x16xbf16>, vector<16x8x16xf32> -> vector<16x8x16xf32>
    "tpu.trace_stop"() : () -> ()
    %11 = vector.extract_strided_slice %3 {offsets = [0, 1, 0, 0], sizes = [16, 1, 8, 16], strides = [1, 1, 1, 1]} : vector<16x2x8x16xbf16> to vector<16x1x8x16xbf16>
    %12 = vector.shape_cast %11 : vector<16x1x8x16xbf16> to vector<16x8x16xbf16>
    %13 = vector.extract_strided_slice %5 {offsets = [0, 1, 0, 0], sizes = [16, 1, 8, 8], strides = [1, 1, 1, 1]} : vector<16x2x8x8xbf16> to vector<16x1x8x8xbf16>
    %14 = vector.shape_cast %13 : vector<16x1x8x8xbf16> to vector<16x8x8xbf16>
    "tpu.trace_start"() <{level = 10 : i32, message = "lik,lkc->lic"}> : () -> ()
    %cst_8 = arith.constant dense<0.000000e+00> : vector<16x8x16xf32>
    %15 = tpu.matmul %14, %12, %cst_8 {dimension_numbers = #tpu.dot_dimension_numbers<[2], [1], [1], [2], [0, 0, 0, 1, 1, 2], [0], [0]>} : vector<16x8x8xbf16>, vector<16x8x16xbf16>, vector<16x8x16xf32> -> vector<16x8x16xf32>
    "tpu.trace_stop"() : () -> ()
    %c0_9 = arith.constant 0 : index
    %c0_10 = arith.constant 0 : index
    %c0_11 = arith.constant 0 : index
    %c0_12 = arith.constant 0 : index
    %16 = vector.load %arg9[%c0_9, %c0_10, %c0_11, %c0_12] : memref<16x2x8x16xf32, #tpu.memory_space<vmem>>, vector<16x2x8x16xf32>
    %17 = vector.shape_cast %10 : vector<16x8x16xf32> to vector<16x1x8x16xf32>
    %18 = vector.shape_cast %15 : vector<16x8x16xf32> to vector<16x1x8x16xf32>
    %19 = tpu.concatenate %17, %18 in 1 : vector<16x1x8x16xf32>, vector<16x1x8x16xf32> -> vector<16x2x8x16xf32>
    %20 = arith.addf %16, %19 : vector<16x2x8x16xf32>
    %c0_13 = arith.constant 0 : index
    %c0_14 = arith.constant 0 : index
    %c0_15 = arith.constant 0 : index
    %c0_16 = arith.constant 0 : index
    %21 = vector.load %arg9[%c0_13, %c0_14, %c0_15, %c0_16] : memref<16x2x8x16xf32, #tpu.memory_space<vmem>>, vector<16x2x8x16xf32>
    tpu.vector_store %arg9[%c0_13, %c0_14, %c0_15, %c0_16], %20 {strides = array<i32>} : memref<16x2x8x16xf32, #tpu.memory_space<vmem>>, vector<16x2x8x16xf32>,
    %c0_i32_17 = arith.constant 0 : i32
    %22 = arith.cmpi eq, %arg3, %c0_i32_17 : i32
    %23 = arith.extui %22 : i1 to i32
    %c0_i32_18 = arith.constant 0 : i32
    %24 = arith.cmpi ne, %23, %c0_i32_18 : i32
    scf.if %24 {
      %c0_19 = arith.constant 0 : index
      %c0_20 = arith.constant 0 : index
      %c0_21 = arith.constant 0 : index
      %c0_22 = arith.constant 0 : index
      %25 = vector.load %arg9[%c0_19, %c0_20, %c0_21, %c0_22] : memref<16x2x8x16xf32, #tpu.memory_space<vmem>>, vector<16x2x8x16xf32>
      %26 = vector.shape_cast %25 : vector<16x2x8x16xf32> to vector<256x16xf32>
      %c0_23 = arith.constant 0 : index
      %c0_24 = arith.constant 0 : index
      %27 = vector.load %arg7[%c0_23, %c0_24] : memref<16x16xf32, #tpu.memory_space<vmem>>, vector<16x16xf32>
      %cst_25 = arith.constant dense<0.000000e+00> : vector<256x16xf32>
      %28 = tpu.matmul %26, %27, %cst_25 {dimension_numbers = #tpu.dot_dimension_numbers<[1], [0], [0], [1], [0, 0, 1, 1], [], []>} : vector<256x16xf32>, vector<16x16xf32>, vector<256x16xf32> -> vector<256x16xf32>
      %c0_26 = arith.constant 0 : index
      %29 = memref.load %arg4[%c0_26] : memref<1xf32, #tpu.memory_space<smem>>
      %cst_27 = arith.constant 0.000000e+00 : f32
      %30 = vector.broadcast %cst_27 : f32 to vector<256x16xf32>
      %31 = arith.cmpf ogt, %28, %30 : vector<256x16xf32>
      %32 = vector.broadcast %29 : f32 to vector<256x16xf32>
      %33 = arith.mulf %32, %28 : vector<256x16xf32>
      %34 = arith.select %31, %28, %33 : vector<256x16xi1>, vector<256x16xf32>
      %35 = vector.shape_cast %34 : vector<256x16xf32> to vector<16x2x8x16xf32>
      %c0_28 = arith.constant 0 : index
      %c0_29 = arith.constant 0 : index
      %c0_30 = arith.constant 0 : index
      %c0_31 = arith.constant 0 : index
      %36 = vector.load %arg8[%c0_28, %c0_29, %c0_30, %c0_31] : memref<16x2x8x16xf32, #tpu.memory_space<vmem>>, vector<16x2x8x16xf32>
      tpu.vector_store %arg8[%c0_28, %c0_29, %c0_30, %c0_31], %35 {strides = array<i32>} : memref<16x2x8x16xf32, #tpu.memory_space<vmem>>, vector<16x2x8x16xf32>,
    } else {
    }
    return
  }
  func.func @transform_0(%arg0: i32, %arg1: i32, %arg2: i32, %arg3: i32) -> i32 {
    %c0_i32 = arith.constant 0 : i32
    %c0_i32_0 = arith.constant 0 : i32
    return %c0_i32 : i32
  }
  func.func @transform_1(%arg0: i32, %arg1: i32, %arg2: i32, %arg3: i32) -> (i32, i32, i32, i32) {
    %c0_i32 = arith.constant 0 : i32
    return %arg0, %arg1, %arg2, %arg3 : i32, i32, i32, i32
  }
  func.func @transform_2(%arg0: i32, %arg1: i32, %arg2: i32, %arg3: i32) -> (i32, i32, i32, i32) {
    %c0_i32 = arith.constant 0 : i32
    %c0_i32_0 = arith.constant 0 : i32
    %c0_i32_1 = arith.constant 0 : i32
    return %arg0, %arg1, %c0_i32, %c0_i32_0 : i32, i32, i32, i32
  }
  func.func @transform_3(%arg0: i32, %arg1: i32, %arg2: i32, %arg3: i32) -> (i32, i32) {
    %c0_i32 = arith.constant 0 : i32
    %c0_i32_0 = arith.constant 0 : i32
    %c0_i32_1 = arith.constant 0 : i32
    return %c0_i32, %c0_i32_0 : i32, i32
  }
  func.func @transform_4(%arg0: i32, %arg1: i32, %arg2: i32, %arg3: i32) -> (i32, i32, i32, i32) {
    %c0_i32 = arith.constant 0 : i32
    %c0_i32_0 = arith.constant 0 : i32
    return %arg0, %arg1, %arg2, %c0_i32 : i32, i32, i32, i32
  }
}

</mosaic_0001>

<bundles_post_ra>
// kernel: sparse_graph_convolution.2
= control target key start
LH: loop header
LB: loop body
LE: loop exit
PB: predicated region body
PF: predicated region fallthrough
CT: control target
= control target key end

     0   :  { %vm23_vm0 = vcmask 130048   ;;  %v1827_v0 = vmov 0.0   ;;  %vm1828_vm1 = vmmov 0   ;;  %s2361_s2 = inlined_call_operand.vmem [shape: bf16[2,8,16,16], index: 2, kind: input, shape index: {}]   ;;  %s2362_s1 = inlined_call_operand.vmem [shape: f32[8,2,16,16], index: 1, kind: input, shape index: {}]   ;;  %s2363_s3 = inlined_call_operand.vmem [shape: f32[16,16], index: 3, kind: input, shape index: {}]   ;;  %s2364_s0 = inlined_call_operand.<no memory space> [shape: f32[1], index: 0, kind: input, shape index: {}]   ;;  %s2365_s4 = inlined_call_operand.vmem [shape: f32[8,2,16,16], index: 4, kind: output, shape index: {}]  }
   0x1   :  { %1655 = vmatprep.subr.bf16.mxu0 %v1827_v0  ;;  %v1811_v1 = vld [vmem:[%s2361_s2] sm:$0xff]   ;;  %1657 = vmatprep.mubr.msk.bf16.mxu0 %vm1828_vm1, %v1827_v0  ;;  %24 = vst.msk [vmem:[#allocation2] sm:$0xff] %vm23_vm0, %v1827_v0  ;;  %25 = vst.msk [vmem:[#allocation2 + $0x8] sm:$0xff] %vm23_vm0, %v1827_v0  ;;  %v89_v3 = vld [vmem:[%s2362_s1 + $0x8] sm:$0xff] }
   0x2   :  { %26 = vst.msk [vmem:[#allocation2 + $0x10] sm:$0xff] %vm23_vm0, %v1827_v0  ;;  %27 = vst.msk [vmem:[#allocation2 + $0x18] sm:$0xff] %vm23_vm0, %v1827_v0  ;;  %v88_v2 = vld [vmem:[%s2362_s1] sm:$0xff]  ;;  %1661 = vmatprep.subr.bf16.mxu1 %v1827_v0  ;;  %1663 = vmatprep.mubr.msk.bf16.mxu1 %vm1828_vm1, %v1827_v0  ;;  %v1812_v5 = vld [vmem:[%s2361_s2 + $0x10] sm:$0xff]  }
   0x3   :  { %28 = vst.msk [vmem:[#allocation2 + $0x20] sm:$0xff] %vm23_vm0, %v1827_v0  ;;  %29 = vst.msk [vmem:[#allocation2 + $0x28] sm:$0xff] %vm23_vm0, %v1827_v0  ;;  %1656 = vmatpush3.bf16.msra.mxu0 %v1811_v1  ;;  %v120_v4 = vpack.c.bf16 %v89_v3, %v88_v2  ;;  %v1813_v6 = vld [vmem:[%s2361_s2 + $0x8] sm:$0xff]   ;;  %v92_v7 = vld [vmem:[%s2362_s1 + $0x20] sm:$0xff] }
   0x4   :  { %30 = vst.msk [vmem:[#allocation2 + $0x30] sm:$0xff] %vm23_vm0, %v1827_v0  ;;  %31 = vst.msk [vmem:[#allocation2 + $0x38] sm:$0xff] %vm23_vm0, %v1827_v0  ;;  %1667 = vmatprep.subr.bf16.mxu0 %v1827_v0  ;;  %v93_v8 = vld [vmem:[%s2362_s1 + $0x28] sm:$0xff]  ;;  %v96_v9 = vld [vmem:[%s2362_s1 + $0x40] sm:$0xff]  ;;  %1662 = vmatpush3.bf16.msra.mxu1 %v1813_v6 }
   0x5   :  { %32 = vst.msk [vmem:[#allocation2 + $0x40] sm:$0xff] %vm23_vm0, %v1827_v0  ;;  %33 = vst.msk [vmem:[#allocation2 + $0x48] sm:$0xff] %vm23_vm0, %v1827_v0  ;;  %v122_v10 = vpack.c.bf16 %v93_v8, %v92_v7  ;;  %v1814_v11 = vld [vmem:[%s2361_s2 + $0x18] sm:$0xff]   ;;  %v97_v12 = vld [vmem:[%s2362_s1 + $0x48] sm:$0xff]  ;;  %1673 = vmatprep.subr.bf16.mxu1 %v1827_v0 }
   0x6   :  { %34 = vst.msk [vmem:[#allocation2 + $0x50] sm:$0xff] %vm23_vm0, %v1827_v0  ;;  %35 = vst.msk [vmem:[#allocation2 + $0x58] sm:$0xff] %vm23_vm0, %v1827_v0  ;;  %1658 = vmatmul.mubr.msk.bf16.vlgmr.msra.gmra.mrb[0].mxu0 %vm23_vm0, %v120_v4  ;;  %v100_v13 = vld [vmem:[%s2362_s1 + $0x60] sm:$0xff]  ;;  %v124_v14 = vpack.c.bf16 %v97_v12, %v96_v9  ;;  %v101_v15 = vld [vmem:[%s2362_s1 + $0x68] sm:$0xff] }
   0x7   :  { %36 = vst.msk [vmem:[#allocation2 + $0x60] sm:$0xff] %vm23_vm0, %v1827_v0  ;;  %37 = vst.msk [vmem:[#allocation2 + $0x68] sm:$0xff] %vm23_vm0, %v1827_v0  ;;  %1668 = vmatpush3.bf16.msra.mxu0 %v1812_v5  ;;  %1669 = vmatprep.mubr.msk.bf16.mxu0 %vm1828_vm1, %v1827_v0  ;;  %v1815_v16 = vld [vmem:[%s2361_s2 + $0x20] sm:$0xff]   ;;  %v126_v17 = vpack.c.bf16 %v101_v15, %v100_v13  ;;  %v1816_v18 = vld [vmem:[%s2361_s2 + $0x28] sm:$0xff]  }
   0x8   :  { %38 = vst.msk [vmem:[#allocation2 + $0x70] sm:$0xff] %vm23_vm0, %v1827_v0  ;;  %39 = vst.msk [vmem:[#allocation2 + $0x78] sm:$0xff] %vm23_vm0, %v1827_v0  ;;  %1679 = vmatprep.subr.bf16.mxu0 %v1827_v0  ;;  %1664 = vmatmul.mubr.msk.bf16.vlgmr.msra.gmra.mrb[0].mxu1 %vm23_vm0, %v122_v10  ;;  %v104_v19 = vld [vmem:[%s2362_s1 + $0x80] sm:$0xff]  ;;  %v105_v20 = vld [vmem:[%s2362_s1 + $0x88] sm:$0xff] }
   0x9   :  { %40 = vst.msk [vmem:[#allocation2 + $0x80] sm:$0xff] %vm23_vm0, %v1827_v0  ;;  %41 = vst.msk [vmem:[#allocation2 + $0x88] sm:$0xff] %vm23_vm0, %v1827_v0  ;;  %1674 = vmatpush3.bf16.msra.mxu1 %v1814_v11  ;;  %1675 = vmatprep.mubr.msk.bf16.mxu1 %vm1828_vm1, %v1827_v0  ;;  %v128_v21 = vpack.c.bf16 %v105_v20, %v104_v19  ;;  %v108_v22 = vld [vmem:[%s2362_s1 + $0xa0] sm:$0xff]  ;;  %v109_v23 = vld [vmem:[%s2362_s1 + $0xa8] sm:$0xff] }
   0xa   :  { %42 = vst.msk [vmem:[#allocation2 + $0x90] sm:$0xff] %vm23_vm0, %v1827_v0  ;;  %43 = vst.msk [vmem:[#allocation2 + $0x98] sm:$0xff] %vm23_vm0, %v1827_v0  ;;  %1685 = vmatprep.subr.bf16.mxu1 %v1827_v0  ;;  %v1817_v24 = vld [vmem:[%s2361_s2 + $0x30] sm:$0xff]   ;;  %v130_v25 = vpack.c.bf16 %v109_v23, %v108_v22  ;;  %v1818_v26 = vld [vmem:[%s2361_s2 + $0x38] sm:$0xff]  }
   0xb   :  { %44 = vst.msk [vmem:[#allocation2 + $0xa0] sm:$0xff] %vm23_vm0, %v1827_v0  ;;  %45 = vst.msk [vmem:[#allocation2 + $0xa8] sm:$0xff] %vm23_vm0, %v1827_v0  ;;  %v112_v27 = vld [vmem:[%s2362_s1 + $0xc0] sm:$0xff]  ;;  %v113_v28 = vld [vmem:[%s2362_s1 + $0xc8] sm:$0xff] }
   0xc   :  { %46 = vst.msk [vmem:[#allocation2 + $0xb0] sm:$0xff] %vm23_vm0, %v1827_v0  ;;  %47 = vst.msk [vmem:[#allocation2 + $0xb8] sm:$0xff] %vm23_vm0, %v1827_v0  ;;  %v116_v29 = vld [vmem:[%s2362_s1 + $0xe0] sm:$0xff]  ;;  %v132_v30 = vpack.c.bf16 %v113_v28, %v112_v27  ;;  %v117_v31 = vld [vmem:[%s2362_s1 + $0xe8] sm:$0xff] }
   0xd   :  { %48 = vst.msk [vmem:[#allocation2 + $0xc0] sm:$0xff] %vm23_vm0, %v1827_v0  ;;  %49 = vst.msk [vmem:[#allocation2 + $0xc8] sm:$0xff] %vm23_vm0, %v1827_v0  ;;  %v1819_v32 = vld [vmem:[%s2361_s2 + $0x40] sm:$0xff]   ;;  %v134_v33 = vpack.c.bf16 %v117_v31, %v116_v29  ;;  %v1820_v34 = vld [vmem:[%s2361_s2 + $0x48] sm:$0xff]  }
   0xe   :  { %50 = vst.msk [vmem:[#allocation2 + $0xd0] sm:$0xff] %vm23_vm0, %v1827_v0  ;;  %51 = vst.msk [vmem:[#allocation2 + $0xd8] sm:$0xff] %vm23_vm0, %v1827_v0  ;;  %1670 = vmatmul.mubr.msk.bf16.vlgmr.msra.gmra.mrb[4].mxu0 %vm23_vm0, %v124_v14  ;;  %v90_v35 = vld [vmem:[%s2362_s1 + $0x10] sm:$0xff]  ;;  %v91_v36 = vld [vmem:[%s2362_s1 + $0x18] sm:$0xff] }
   0xf   :  { %52 = vst.msk [vmem:[#allocation2 + $0xe0] sm:$0xff] %vm23_vm0, %v1827_v0  ;;  %53 = vst.msk [vmem:[#allocation2 + $0xe8] sm:$0xff] %vm23_vm0, %v1827_v0  ;;  %1680 = vmatpush3.bf16.msra.mxu0 %v1815_v16  ;;  %1681 = vmatprep.mubr.msk.bf16.mxu0 %vm1828_vm1, %v1827_v0  ;;  %v121_v37 = vpack.c.bf16 %v91_v36, %v90_v35  ;;  %v94_v38 = vld [vmem:[%s2362_s1 + $0x30] sm:$0xff]  ;;  %v95_v39 = vld [vmem:[%s2362_s1 + $0x38] sm:$0xff] }
  0x10   :  { %54 = vst.msk [vmem:[#allocation2 + $0xf0] sm:$0xff] %vm23_vm0, %v1827_v0  ;;  %55 = vst.msk [vmem:[#allocation2 + $0xf8] sm:$0xff] %vm23_vm0, %v1827_v0  ;;  %1691 = vmatprep.subr.bf16.mxu0 %v1827_v0  ;;  %1676 = vmatmul.mubr.msk.bf16.vlgmr.msra.gmra.mrb[4].mxu1 %vm23_vm0, %v126_v17  ;;  %v1821_v40 = vld [vmem:[%s2361_s2 + $0x50] sm:$0xff]   ;;  %v123_v41 = vpack.c.bf16 %v95_v39, %v94_v38  ;;  %v1822_v42 = vld [vmem:[%s2361_s2 + $0x58] sm:$0xff]  }
  0x11   :  { %1686 = vmatpush3.bf16.msra.mxu1 %v1816_v18  ;;  %1687 = vmatprep.mubr.msk.bf16.mxu1 %vm1828_vm1, %v1827_v0  ;;  %v98_v43 = vld [vmem:[%s2362_s1 + $0x50] sm:$0xff]  ;;  %v99_v44 = vld [vmem:[%s2362_s1 + $0x58] sm:$0xff]  ;;  %v1823_v48 = vld [vmem:[%s2361_s2 + $0x60] sm:$0xff]  }
  0x12   :  { %1697 = vmatprep.subr.bf16.mxu1 %v1827_v0  ;;  %v125_v45 = vpack.c.bf16 %v99_v44, %v98_v43  ;;  %v102_v46 = vld [vmem:[%s2362_s1 + $0x70] sm:$0xff]  ;;  %v103_v47 = vld [vmem:[%s2362_s1 + $0x78] sm:$0xff]  ;;  %v1824_v50 = vld [vmem:[%s2361_s2 + $0x68] sm:$0xff]  }
  0x13   :  { %v127_v49 = vpack.c.bf16 %v103_v47, %v102_v46  ;;  %v106_v51 = vld [vmem:[%s2362_s1 + $0x90] sm:$0xff]  ;;  %v107_v52 = vld [vmem:[%s2362_s1 + $0x98] sm:$0xff]  ;;  %v1068_v2 = vld [vmem:[%s2363_s3] sm:$0xff] }
  0x14   :  { %v129_v53 = vpack.c.bf16 %v107_v52, %v106_v51  ;;  %v110_v54 = vld [vmem:[%s2362_s1 + $0xb0] sm:$0xff]  ;;  %v111_v55 = vld [vmem:[%s2362_s1 + $0xb8] sm:$0xff]  ;;  %v937_v4 = vld [vmem:[#allocation2] sm:$0xff] }
  0x15   :  { %v1825_v56 = vld [vmem:[%s2361_s2 + $0x70] sm:$0xff]   ;;  %v131_v57 = vpack.c.bf16 %v111_v55, %v110_v54  ;;  %v1826_v58 = vld [vmem:[%s2361_s2 + $0x78] sm:$0xff]   ;;  %v938_v6 = vld [vmem:[#allocation2 + $0x8] sm:$0xff] }
  0x16   :  { %1682 = vmatmul.mubr.msk.bf16.vlgmr.msra.gmra.mrb[8].mxu0 %vm23_vm0, %v128_v21  ;;  %v114_v59 = vld [vmem:[%s2362_s1 + $0xd0] sm:$0xff]  ;;  %v115_v60 = vld [vmem:[%s2362_s1 + $0xd8] sm:$0xff]  ;;  %v941_v9 = vld [vmem:[#allocation2 + $0x20] sm:$0xff] }
  0x17   :  { %1692 = vmatpush3.bf16.msra.mxu0 %v1817_v24  ;;  %1693 = vmatprep.mubr.msk.bf16.mxu0 %vm1828_vm1, %v1827_v0  ;;  %v133_v61 = vpack.c.bf16 %v115_v60, %v114_v59  ;;  %v118_v62 = vld [vmem:[%s2362_s1 + $0xf0] sm:$0xff]  ;;  %v119_v63 = vld [vmem:[%s2362_s1 + $0xf8] sm:$0xff]  ;;  %v942_v14 = vld [vmem:[#allocation2 + $0x28] sm:$0xff] }
  0x18   :  { %1703 = vmatprep.subr.bf16.mxu0 %v1827_v0  ;;  %1688 = vmatmul.mubr.msk.bf16.vlgmr.msra.gmra.mrb[8].mxu1 %vm23_vm0, %v130_v25  ;;  %v135_v1 = vpack.c.bf16 %v119_v63, %v118_v62  ;;  %v945_v19 = vld [vmem:[#allocation2 + $0x40] sm:$0xff]  ;;  %v946_v22 = vld [vmem:[#allocation2 + $0x48] sm:$0xff] }
  0x19   :  { %1698 = vmatpush3.bf16.msra.mxu1 %v1818_v26  ;;  %1699 = vmatprep.mubr.msk.bf16.mxu1 %vm1828_vm1, %v1827_v0  ;;  %v949_v25 = vld [vmem:[#allocation2 + $0x60] sm:$0xff]  ;;  %v950_v31 = vld [vmem:[#allocation2 + $0x68] sm:$0xff] }
  0x1a   :  { %1709 = vmatprep.subr.bf16.mxu1 %v1827_v0  ;;  %v957_v43 = vld [vmem:[#allocation2 + $0xa0] sm:$0xff] }
  0x1b   :  { %v965_v59 = vld [vmem:[#allocation2 + $0xe0] sm:$0xff] }
  0x1e   :  { %1694 = vmatmul.mubr.msk.bf16.vlgmr.msra.gmra.mrb[12].mxu0 %vm23_vm0, %v132_v30 }
  0x1f   :  { %1704 = vmatpush3.bf16.msra.mxu0 %v1819_v32  ;;  %1705 = vmatprep.mubr.msk.bf16.mxu0 %vm1828_vm1, %v1827_v0 }
  0x20   :  { %1715 = vmatprep.subr.bf16.mxu0 %v1827_v0  ;;  %1700 = vmatmul.mubr.msk.bf16.vlgmr.msra.gmra.mrb[12].mxu1 %vm23_vm0, %v134_v33 }
  0x21   :  { %1710 = vmatpush3.bf16.msra.mxu1 %v1820_v34  ;;  %1711 = vmatprep.mubr.msk.bf16.mxu1 %vm1828_vm1, %v1827_v0 }
  0x22   :  { %1721 = vmatprep.subr.bf16.mxu1 %v1827_v0 }
  0x26   :  { %1706 = vmatmul.mubr.msk.bf16.vlgmr.msra.gmra.mrb[16].mxu0 %vm23_vm0, %v121_v37  ;;  %v953_v37 = vld [vmem:[#allocation2 + $0x80] sm:$0xff] }
  0x27   :  { %1716 = vmatpush3.bf16.msra.mxu0 %v1821_v40  ;;  %1717 = vmatprep.mubr.msk.bf16.mxu0 %vm1828_vm1, %v1827_v0  ;;  %v954_v40 = vld [vmem:[#allocation2 + $0x88] sm:$0xff] }
  0x28   :  { %1727 = vmatprep.subr.bf16.mxu0 %v1827_v0  ;;  %1712 = vmatmul.mubr.msk.bf16.vlgmr.msra.gmra.mrb[16].mxu1 %vm23_vm0, %v123_v41 }
  0x29   :  { %1722 = vmatpush3.bf16.msra.mxu1 %v1822_v42  ;;  %1723 = vmatprep.mubr.msk.bf16.mxu1 %vm1828_vm1, %v1827_v0 }
  0x2a   :  { %1733 = vmatprep.subr.bf16.mxu1 %v1827_v0 }
  0x2e   :  { %1718 = vmatmul.mubr.msk.bf16.vlgmr.msra.gmra.mrb[20].mxu0 %vm23_vm0, %v125_v45 }
  0x2f   :  { %1728 = vmatpush3.bf16.msra.mxu0 %v1823_v48  ;;  %1729 = vmatprep.mubr.msk.bf16.mxu0 %vm1828_vm1, %v1827_v0  ;;  %v958_v48 = vld [vmem:[#allocation2 + $0xa8] sm:$0xff] }
  0x30   :  { %1739 = vmatprep.subr.bf16.mxu0 %v1827_v0  ;;  %1724 = vmatmul.mubr.msk.bf16.vlgmr.msra.gmra.mrb[20].mxu1 %vm23_vm0, %v127_v49 }
  0x31   :  { %1734 = vmatpush3.bf16.msra.mxu1 %v1824_v50  ;;  %1735 = vmatprep.mubr.msk.bf16.mxu1 %vm1828_vm1, %v1827_v0 }
  0x32   :  { %1745 = vmatprep.subr.bf16.mxu1 %v1827_v0 }
  0x36   :  { %1730 = vmatmul.mubr.msk.bf16.vlgmr.msra.gmra.mrb[24].mxu0 %vm23_vm0, %v129_v53  ;;  %v961_v53 = vld [vmem:[#allocation2 + $0xc0] sm:$0xff] }
  0x37   :  { %1740 = vmatpush3.bf16.msra.mxu0 %v1825_v56  ;;  %1741 = vmatprep.mubr.msk.bf16.mxu0 %vm1828_vm1, %v1827_v0  ;;  %v962_v56 = vld [vmem:[#allocation2 + $0xc8] sm:$0xff] }
  0x38   :  { %1736 = vmatmul.mubr.msk.bf16.vlgmr.msra.gmra.mrb[24].mxu1 %vm23_vm0, %v131_v57 }
  0x39   :  { %1746 = vmatpush3.bf16.msra.mxu1 %v1826_v58  ;;  %1747 = vmatprep.mubr.msk.bf16.mxu1 %vm1828_vm1, %v1827_v0  ;;  %v1069_v0 = vld [vmem:[%s2363_s3 + $0x8] sm:$0xff] }
  0x3a   :  { %v1803_v3 = vpack.c.bf16 %v1069_v0, %v1068_v2  ;;  %v966_v2 = vld [vmem:[#allocation2 + $0xe8] sm:$0xff] }
  0x3c   :  { %1804 = vmatprep.subr.bf16.mxu0 %v1803_v3  ;;  %1807 = vmatprep.subr.bf16.mxu1 %v1803_v3 }
  0x3e   :  { %1742 = vmatmul.mubr.msk.bf16.vlgmr.msra.gmra.mrb[28].mxu0 %vm23_vm0, %v133_v61 }
  0x3f   :  { %1806 = vmatpush3.bf16.msra.mxu0 %v1803_v3 }
  0x40   :  { %1748 = vmatmul.mubr.msk.bf16.vlgmr.msra.gmra.mrb[28].mxu1 %vm23_vm0, %v135_v1 }
  0x41   :  { %1808 = vmatpush3.bf16.msra.mxu1 %v1803_v3 }
  0xd9   :  { %v180_v5 = vpop.f32.mrb[0].mxu0 }
  0xda   :  { %v969_v7 = vadd.f32 %v937_v4, %v180_v5  ;;  %v1659_v8 = vpop.f32.mrb[1].mxu0 }
  0xdb   :  { %v183_v10 = vpop.f32.mrb[2].mxu0  ;;  %v230_v13 = vpop.f32.mrb[0].mxu1 }
  0xdc   :  { %1001 = vst.msk [vmem:[#allocation2] sm:$0xff] %vm23_vm0, %v969_v7  ;;  %v970_v11 = vadd.f32 %v938_v6, %v183_v10  ;;  %v1660_v12 = vpop.f32.mrb[3].mxu0  ;;  %v973_v15 = vadd.f32 %v941_v9, %v230_v13  ;;  %v1665_v16 = vpop.f32.mrb[1].mxu1  ;;  %v939_v7 = vld [vmem:[#allocation2 + $0x10] sm:$0xff]  ;;  %v940_v10 = vld [vmem:[#allocation2 + $0x18] sm:$0xff] }
  0xdd   :  { %v233_v17 = vpop.f32.mrb[2].mxu1  ;;  %v943_v13 = vld [vmem:[#allocation2 + $0x30] sm:$0xff] }
  0xde   :  { %1002 = vst.msk [vmem:[#allocation2 + $0x8] sm:$0xff] %vm23_vm0, %v970_v11  ;;  %1005 = vst.msk [vmem:[#allocation2 + $0x20] sm:$0xff] %vm23_vm0, %v973_v15  ;;  %v974_v18 = vadd.f32 %v942_v14, %v233_v17  ;;  %v1666_v20 = vpop.f32.mrb[3].mxu1 }
  0xe0   :  { %1006 = vst.msk [vmem:[#allocation2 + $0x28] sm:$0xff] %vm23_vm0, %v974_v18  ;;  %v944_v18 = vld [vmem:[#allocation2 + $0x38] sm:$0xff] }
  0xe1   :  { %v280_v21 = vpop.f32.mrb[4].mxu0 }
  0xe2   :  { %v977_v23 = vadd.f32 %v945_v19, %v280_v21  ;;  %v1671_v24 = vpop.f32.mrb[5].mxu0 }
  0xe3   :  { %v283_v26 = vpop.f32.mrb[6].mxu0  ;;  %v1036_v27 = vld [vmem:[#allocation2] sm:$0xff]  ;;  %v330_v30 = vpop.f32.mrb[4].mxu1 }
  0xe4   :  { %1009 = vst.msk [vmem:[#allocation2 + $0x40] sm:$0xff] %vm23_vm0, %v977_v23  ;;  %v978_v28 = vadd.f32 %v946_v22, %v283_v26  ;;  %v1672_v29 = vpop.f32.mrb[7].mxu0  ;;  %1755 = vmatprep.mubr.msk.f32.mxu0 %vm23_vm0, %v1036_v27  ;;  %v981_v33 = vadd.f32 %v949_v25, %v330_v30  ;;  %v1677_v34 = vpop.f32.mrb[5].mxu1  ;;  %v947_v23 = vld [vmem:[#allocation2 + $0x50] sm:$0xff]  ;;  %v948_v26 = vld [vmem:[#allocation2 + $0x58] sm:$0xff] }
  0xe5   :  { %v1037_v32 = vld [vmem:[#allocation2 + $0x8] sm:$0xff]  ;;  %v333_v35 = vpop.f32.mrb[6].mxu1  ;;  %v951_v29 = vld [vmem:[#allocation2 + $0x70] sm:$0xff] }
  0xe6   :  { %1010 = vst.msk [vmem:[#allocation2 + $0x48] sm:$0xff] %vm23_vm0, %v978_v28  ;;  %1756 = vmatmul.mubr.msk.f32.vlgmr.msra.gmra.mrb[32].mxu0 %vm23_vm0, %v1037_v32  ;;  %1013 = vst.msk [vmem:[#allocation2 + $0x60] sm:$0xff] %vm23_vm0, %v981_v33  ;;  %v982_v36 = vadd.f32 %v950_v31, %v333_v35  ;;  %v1678_v38 = vpop.f32.mrb[7].mxu1  ;;  %v952_v35 = vld [vmem:[#allocation2 + $0x78] sm:$0xff] }
  0xe8   :  { %1014 = vst.msk [vmem:[#allocation2 + $0x68] sm:$0xff] %vm23_vm0, %v982_v36 }
  0xe9   :  { %v380_v39 = vpop.f32.mrb[8].mxu0 }
  0xea   :  { %v985_v41 = vadd.f32 %v953_v37, %v380_v39  ;;  %v1683_v42 = vpop.f32.mrb[9].mxu0  ;;  %v1040_v39 = vld [vmem:[#allocation2 + $0x20] sm:$0xff] }
  0xeb   :  { %v383_v44 = vpop.f32.mrb[10].mxu0  ;;  %v430_v47 = vpop.f32.mrb[8].mxu1  ;;  %v955_v42 = vld [vmem:[#allocation2 + $0x90] sm:$0xff] }
  0xec   :  { %1017 = vst.msk [vmem:[#allocation2 + $0x80] sm:$0xff] %vm23_vm0, %v985_v41  ;;  %v986_v45 = vadd.f32 %v954_v40, %v383_v44  ;;  %v1684_v46 = vpop.f32.mrb[11].mxu0  ;;  %v989_v49 = vadd.f32 %v957_v43, %v430_v47  ;;  %v1689_v50 = vpop.f32.mrb[9].mxu1  ;;  %v956_v47 = vld [vmem:[#allocation2 + $0x98] sm:$0xff] }
  0xed   :  { %v433_v51 = vpop.f32.mrb[10].mxu1  ;;  %v1041_v46 = vld [vmem:[#allocation2 + $0x28] sm:$0xff]  ;;  %v959_v50 = vld [vmem:[#allocation2 + $0xb0] sm:$0xff] }
  0xee   :  { %1018 = vst.msk [vmem:[#allocation2 + $0x88] sm:$0xff] %vm23_vm0, %v986_v45  ;;  %1021 = vst.msk [vmem:[#allocation2 + $0xa0] sm:$0xff] %vm23_vm0, %v989_v49  ;;  %v990_v52 = vadd.f32 %v958_v48, %v433_v51  ;;  %v1690_v54 = vpop.f32.mrb[11].mxu1 }
  0xf0   :  { %1022 = vst.msk [vmem:[#allocation2 + $0xa8] sm:$0xff] %vm23_vm0, %v990_v52 }
  0xf1   :  { %v480_v55 = vpop.f32.mrb[12].mxu0 }
  0xf2   :  { %v993_v57 = vadd.f32 %v961_v53, %v480_v55  ;;  %v1695_v58 = vpop.f32.mrb[13].mxu0  ;;  %v960_v55 = vld [vmem:[#allocation2 + $0xb8] sm:$0xff] }
  0xf3   :  { %v483_v60 = vpop.f32.mrb[14].mxu0  ;;  %v1052_v61 = vld [vmem:[#allocation2 + $0x80] sm:$0xff]  ;;  %v530_v1 = vpop.f32.mrb[12].mxu1 }
  0xf4   :  { %1025 = vst.msk [vmem:[#allocation2 + $0xc0] sm:$0xff] %vm23_vm0, %v993_v57  ;;  %v994_v62 = vadd.f32 %v962_v56, %v483_v60  ;;  %v1696_v63 = vpop.f32.mrb[15].mxu0  ;;  %1779 = vmatprep.mubr.msk.f32.mxu1 %vm23_vm0, %v1052_v61  ;;  %v997_v3 = vadd.f32 %v965_v59, %v530_v1  ;;  %v1701_v4 = vpop.f32.mrb[13].mxu1  ;;  %v1044_v59 = vld [vmem:[#allocation2 + $0x40] sm:$0xff]  ;;  %v1045_v1 = vld [vmem:[#allocation2 + $0x48] sm:$0xff] }
  0xf5   :  { %v1053_v0 = vld [vmem:[#allocation2 + $0x88] sm:$0xff]  ;;  %v533_v5 = vpop.f32.mrb[14].mxu1  ;;  %v963_v63 = vld [vmem:[#allocation2 + $0xd0] sm:$0xff] }
  0xf6   :  { %1026 = vst.msk [vmem:[#allocation2 + $0xc8] sm:$0xff] %vm23_vm0, %v994_v62  ;;  %1780 = vmatmul.mubr.msk.f32.vlgmr.msra.gmra.mrb[32].mxu1 %vm23_vm0, %v1053_v0  ;;  %1029 = vst.msk [vmem:[#allocation2 + $0xe0] sm:$0xff] %vm23_vm0, %v997_v3  ;;  %v998_v6 = vadd.f32 %v966_v2, %v533_v5  ;;  %v1702_v8 = vpop.f32.mrb[15].mxu1  ;;  %v964_v0 = vld [vmem:[#allocation2 + $0xd8] sm:$0xff] }
  0xf8   :  { %1030 = vst.msk [vmem:[#allocation2 + $0xe8] sm:$0xff] %vm23_vm0, %v998_v6  ;;  %v967_v6 = vld [vmem:[#allocation2 + $0xf0] sm:$0xff] }
  0xf9   :  { %v580_v9 = vpop.f32.mrb[16].mxu0 }
  0xfa   :  { %v971_v11 = vadd.f32 %v939_v7, %v580_v9  ;;  %v1707_v12 = vpop.f32.mrb[17].mxu0 }
  0xfb   :  { %v583_v14 = vpop.f32.mrb[18].mxu0  ;;  %v630_v17 = vpop.f32.mrb[16].mxu1  ;;  %v968_v12 = vld [vmem:[#allocation2 + $0xf8] sm:$0xff] }
  0xfc   :  { %1003 = vst.msk [vmem:[#allocation2 + $0x10] sm:$0xff] %vm23_vm0, %v971_v11  ;;  %v972_v15 = vadd.f32 %v940_v10, %v583_v14  ;;  %v1708_v16 = vpop.f32.mrb[19].mxu0  ;;  %v975_v19 = vadd.f32 %v943_v13, %v630_v17  ;;  %v1713_v20 = vpop.f32.mrb[17].mxu1  ;;  %v1048_v17 = vld [vmem:[#allocation2 + $0x60] sm:$0xff] }
  0xfd   :  { %v633_v21 = vpop.f32.mrb[18].mxu1 }
  0xfe   :  { %1004 = vst.msk [vmem:[#allocation2 + $0x18] sm:$0xff] %vm23_vm0, %v972_v15  ;;  %1007 = vst.msk [vmem:[#allocation2 + $0x30] sm:$0xff] %vm23_vm0, %v975_v19  ;;  %v976_v22 = vadd.f32 %v944_v18, %v633_v21  ;;  %v1714_v24 = vpop.f32.mrb[19].mxu1  ;;  %v1056_v18 = vld [vmem:[#allocation2 + $0xa0] sm:$0xff] }
  0xff   :  { %v1057_v24 = vld [vmem:[#allocation2 + $0xa8] sm:$0xff] }
 0x100   :  { %1008 = vst.msk [vmem:[#allocation2 + $0x38] sm:$0xff] %vm23_vm0, %v976_v22 }
 0x101   :  { %v680_v25 = vpop.f32.mrb[20].mxu0 }
 0x102   :  { %v979_v27 = vadd.f32 %v947_v23, %v680_v25  ;;  %v1719_v28 = vpop.f32.mrb[21].mxu0  ;;  %v1049_v23 = vld [vmem:[#allocation2 + $0x68] sm:$0xff] }
 0x103   :  { %v683_v30 = vpop.f32.mrb[22].mxu0  ;;  %v1038_v31 = vld [vmem:[#allocation2 + $0x10] sm:$0xff]  ;;  %v730_v34 = vpop.f32.mrb[20].mxu1  ;;  %v1060_v28 = vld [vmem:[#allocation2 + $0xc0] sm:$0xff] }
 0x104   :  { %1011 = vst.msk [vmem:[#allocation2 + $0x50] sm:$0xff] %vm23_vm0, %v979_v27  ;;  %v980_v32 = vadd.f32 %v948_v26, %v683_v30  ;;  %v1720_v33 = vpop.f32.mrb[23].mxu0  ;;  %1758 = vmatprep.mubr.msk.f32.mxu0 %vm23_vm0, %v1038_v31  ;;  %v983_v37 = vadd.f32 %v951_v29, %v730_v34  ;;  %v1725_v38 = vpop.f32.mrb[21].mxu1  ;;  %v1061_v30 = vld [vmem:[#allocation2 + $0xc8] sm:$0xff] }
 0x105   :  { %v1039_v36 = vld [vmem:[#allocation2 + $0x18] sm:$0xff]  ;;  %v733_v40 = vpop.f32.mrb[22].mxu1  ;;  %v1042_v44 = vld [vmem:[#allocation2 + $0x30] sm:$0xff]  ;;  %v1065_v34 = vld [vmem:[#allocation2 + $0xe8] sm:$0xff] }
 0x106   :  { %1012 = vst.msk [vmem:[#allocation2 + $0x58] sm:$0xff] %vm23_vm0, %v980_v32  ;;  %1759 = vmatmul.mubr.msk.f32.gmra.mrb[34].mxu0 %vm23_vm0, %v1039_v36  ;;  %1015 = vst.msk [vmem:[#allocation2 + $0x70] sm:$0xff] %vm23_vm0, %v983_v37  ;;  %v984_v41 = vadd.f32 %v952_v35, %v733_v40  ;;  %v1726_v43 = vpop.f32.mrb[23].mxu1  ;;  %v1064_v32 = vld [vmem:[#allocation2 + $0xe0] sm:$0xff]  ;;  %v2199_v36 = vstv %s2364_s0 }
 0x107   :  { %1761 = vmatprep.mubr.msk.f32.mxu0 %vm23_vm0, %v1040_v39  ;;  %v1043_v56 = vld [vmem:[#allocation2 + $0x38] sm:$0xff] }
 0x108   :  { %1016 = vst.msk [vmem:[#allocation2 + $0x78] sm:$0xff] %vm23_vm0, %v984_v41 }
 0x109   :  { %v780_v45 = vpop.f32.mrb[24].mxu0 }
 0x10a   :  { %v987_v48 = vadd.f32 %v955_v42, %v780_v45  ;;  %v1731_v49 = vpop.f32.mrb[25].mxu0  ;;  %1762 = vmatmul.mubr.msk.f32.gmra.mrb[36].mxu0 %vm23_vm0, %v1041_v46 }
 0x10b   :  { %v783_v51 = vpop.f32.mrb[26].mxu0  ;;  %1764 = vmatprep.mubr.msk.f32.mxu0 %vm23_vm0, %v1042_v44  ;;  %v830_v54 = vpop.f32.mrb[24].mxu1  ;;  %v1046_v3 = vld [vmem:[#allocation2 + $0x50] sm:$0xff] }
 0x10c   :  { %1019 = vst.msk [vmem:[#allocation2 + $0x90] sm:$0xff] %vm23_vm0, %v987_v48  ;;  %v988_v52 = vadd.f32 %v956_v47, %v783_v51  ;;  %v1732_v53 = vpop.f32.mrb[27].mxu0  ;;  %v991_v57 = vadd.f32 %v959_v50, %v830_v54  ;;  %v1737_v58 = vpop.f32.mrb[25].mxu1 }
 0x10d   :  { %v833_v60 = vpop.f32.mrb[26].mxu1  ;;  %v1047_v13 = vld [vmem:[#allocation2 + $0x58] sm:$0xff]  ;;  %v1050_v25 = vld [vmem:[#allocation2 + $0x70] sm:$0xff] }
 0x10e   :  { %1020 = vst.msk [vmem:[#allocation2 + $0x98] sm:$0xff] %vm23_vm0, %v988_v52  ;;  %1765 = vmatmul.mubr.msk.f32.gmra.mrb[38].mxu0 %vm23_vm0, %v1043_v56  ;;  %1023 = vst.msk [vmem:[#allocation2 + $0xb0] sm:$0xff] %vm23_vm0, %v991_v57  ;;  %v992_v61 = vadd.f32 %v960_v55, %v833_v60  ;;  %v1738_v62 = vpop.f32.mrb[27].mxu1 }
 0x10f   :  { %1767 = vmatprep.mubr.msk.f32.mxu0 %vm23_vm0, %v1044_v59  ;;  %v1051_v26 = vld [vmem:[#allocation2 + $0x78] sm:$0xff] }
 0x110   :  { %1024 = vst.msk [vmem:[#allocation2 + $0xb8] sm:$0xff] %vm23_vm0, %v992_v61 }
 0x111   :  { %v880_v2 = vpop.f32.mrb[28].mxu0 }
 0x112   :  { %1768 = vmatmul.mubr.msk.f32.gmra.mrb[40].mxu0 %vm23_vm0, %v1045_v1  ;;  %v995_v4 = vadd.f32 %v963_v63, %v880_v2  ;;  %v1743_v5 = vpop.f32.mrb[29].mxu0 }
 0x113   :  { %1770 = vmatprep.mubr.msk.f32.mxu0 %vm23_vm0, %v1046_v3  ;;  %v1054_v7 = vld [vmem:[#allocation2 + $0x90] sm:$0xff]  ;;  %v883_v8 = vpop.f32.mrb[30].mxu0  ;;  %v930_v11 = vpop.f32.mrb[28].mxu1 }
 0x114   :  { %1782 = vmatprep.mubr.msk.f32.mxu1 %vm23_vm0, %v1054_v7  ;;  %1027 = vst.msk [vmem:[#allocation2 + $0xd0] sm:$0xff] %vm23_vm0, %v995_v4  ;;  %v996_v9 = vadd.f32 %v964_v0, %v883_v8  ;;  %v1744_v10 = vpop.f32.mrb[31].mxu0  ;;  %v999_v15 = vadd.f32 %v967_v6, %v930_v11  ;;  %v1749_v16 = vpop.f32.mrb[29].mxu1 }
 0x115   :  { %v1055_v14 = vld [vmem:[#allocation2 + $0x98] sm:$0xff]  ;;  %v933_v19 = vpop.f32.mrb[30].mxu1  ;;  %v1058_v22 = vld [vmem:[#allocation2 + $0xb0] sm:$0xff] }
 0x116   :  { %1771 = vmatmul.mubr.msk.f32.gmra.mrb[42].mxu0 %vm23_vm0, %v1047_v13  ;;  %1783 = vmatmul.mubr.msk.f32.gmra.mrb[34].mxu1 %vm23_vm0, %v1055_v14  ;;  %1028 = vst.msk [vmem:[#allocation2 + $0xd8] sm:$0xff] %vm23_vm0, %v996_v9  ;;  %1031 = vst.msk [vmem:[#allocation2 + $0xf0] sm:$0xff] %vm23_vm0, %v999_v15  ;;  %v1000_v20 = vadd.f32 %v968_v12, %v933_v19  ;;  %v1750_v21 = vpop.f32.mrb[31].mxu1 }
 0x117   :  { %1773 = vmatprep.mubr.msk.f32.mxu0 %vm23_vm0, %v1048_v17  ;;  %1785 = vmatprep.mubr.msk.f32.mxu1 %vm23_vm0, %v1056_v18  ;;  %v1059_v27 = vld [vmem:[#allocation2 + $0xb8] sm:$0xff] }
 0x118   :  { %1032 = vst.msk [vmem:[#allocation2 + $0xf8] sm:$0xff] %vm23_vm0, %v1000_v20 }
 0x11a   :  { %1774 = vmatmul.mubr.msk.f32.gmra.mrb[44].mxu0 %vm23_vm0, %v1049_v23  ;;  %1786 = vmatmul.mubr.msk.f32.gmra.mrb[36].mxu1 %vm23_vm0, %v1057_v24 }
 0x11b   :  { %1776 = vmatprep.mubr.msk.f32.mxu0 %vm23_vm0, %v1050_v25  ;;  %1788 = vmatprep.mubr.msk.f32.mxu1 %vm23_vm0, %v1058_v22  ;;  %v1062_v29 = vld [vmem:[#allocation2 + $0xd0] sm:$0xff] }
 0x11d   :  { %v1063_v31 = vld [vmem:[#allocation2 + $0xd8] sm:$0xff]  ;;  %v1066_v33 = vld [vmem:[#allocation2 + $0xf0] sm:$0xff] }
 0x11e   :  { %1777 = vmatmul.mubr.msk.f32.gmra.mrb[46].mxu0 %vm23_vm0, %v1051_v26  ;;  %1789 = vmatmul.mubr.msk.f32.gmra.mrb[38].mxu1 %vm23_vm0, %v1059_v27 }
 0x11f   :  { %1791 = vmatprep.mubr.msk.f32.mxu1 %vm23_vm0, %v1060_v28  ;;  %v1067_v35 = vld [vmem:[#allocation2 + $0xf8] sm:$0xff] }
 0x122   :  { %1792 = vmatmul.mubr.msk.f32.gmra.mrb[40].mxu1 %vm23_vm0, %v1061_v30 }
 0x123   :  { %1794 = vmatprep.mubr.msk.f32.mxu1 %vm23_vm0, %v1062_v29 }
 0x126   :  { %1795 = vmatmul.mubr.msk.f32.gmra.mrb[42].mxu1 %vm23_vm0, %v1063_v31 }
 0x127   :  { %1797 = vmatprep.mubr.msk.f32.mxu1 %vm23_vm0, %v1064_v32 }
 0x12a   :  { %1798 = vmatmul.mubr.msk.f32.gmra.mrb[44].mxu1 %vm23_vm0, %v1065_v34 }
 0x12b   :  { %1800 = vmatprep.mubr.msk.f32.mxu1 %vm23_vm0, %v1066_v33 }
 0x12e   :  { %1801 = vmatmul.mubr.msk.f32.gmra.mrb[46].mxu1 %vm23_vm0, %v1067_v35 }
 0x1b9   :  { %v1757_v37 = vpop.f32.mrb[32].mxu0 }
 0x1ba   :  { %vm1393_vm2 = vcmp.gt.f32.partialorder %v1757_v37, 0.0  ;;  %v1426_v38 = vmul.f32 %v1757_v37, %v2199_v36  ;;  %v1232_v39 = vpop.f32.mrb[33].mxu0 }
 0x1bb   :  { %vm1392_vm3 = vcmp.gt.f32.partialorder %v1232_v39, 0.0  ;;  %v1425_v40 = vmul.f32 %v2199_v36, %v1232_v39 }
 0x1bc   :  { %v1458_v41 = vsel %vm1393_vm2, %v1757_v37, %v1426_v38 }
 0x1bd   :  { %1490 = vst.msk [vmem:[%s2365_s4 + $0x8] sm:$0xff] %vm23_vm0, %v1458_v41  ;;  %v1457_v42 = vsel %vm1392_vm3, %v1232_v39, %v1425_v40 }
 0x1be   :  { %1489 = vst.msk [vmem:[%s2365_s4] sm:$0xff] %vm23_vm0, %v1457_v42 }
 0x1c9   :  { %v1781_v43 = vpop.f32.mrb[32].mxu1 }
 0x1ca   :  { %vm1409_vm4 = vcmp.gt.f32.partialorder %v1781_v43, 0.0  ;;  %v1442_v44 = vmul.f32 %v1781_v43, %v2199_v36  ;;  %v1312_v45 = vpop.f32.mrb[33].mxu1 }
 0x1cb   :  { %vm1408_vm5 = vcmp.gt.f32.partialorder %v1312_v45, 0.0  ;;  %v1441_v46 = vmul.f32 %v2199_v36, %v1312_v45 }
 0x1cc   :  { %v1474_v47 = vsel %vm1409_vm4, %v1781_v43, %v1442_v44 }
 0x1cd   :  { %1506 = vst.msk [vmem:[%s2365_s4 + $0x88] sm:$0xff] %vm23_vm0, %v1474_v47  ;;  %v1473_v48 = vsel %vm1408_vm5, %v1312_v45, %v1441_v46 }
 0x1ce   :  { %1505 = vst.msk [vmem:[%s2365_s4 + $0x80] sm:$0xff] %vm23_vm0, %v1473_v48 }
 0x1d9   :  { %v1760_v49 = vpop.f32.mrb[34].mxu0 }
 0x1da   :  { %vm1395_vm6 = vcmp.gt.f32.partialorder %v1760_v49, 0.0  ;;  %v1428_v50 = vmul.f32 %v1760_v49, %v2199_v36  ;;  %v1242_v51 = vpop.f32.mrb[35].mxu0 }
 0x1db   :  { %vm1394_vm7 = vcmp.gt.f32.partialorder %v1242_v51, 0.0  ;;  %v1427_v52 = vmul.f32 %v2199_v36, %v1242_v51 }
 0x1dc   :  { %v1460_v53 = vsel %vm1395_vm6, %v1760_v49, %v1428_v50 }
 0x1dd   :  { %1492 = vst.msk [vmem:[%s2365_s4 + $0x18] sm:$0xff] %vm23_vm0, %v1460_v53  ;;  %v1459_v54 = vsel %vm1394_vm7, %v1242_v51, %v1427_v52  ;;  %v1763_v55 = vpop.f32.mrb[36].mxu0 }
 0x1de   :  { %1491 = vst.msk [vmem:[%s2365_s4 + $0x10] sm:$0xff] %vm23_vm0, %v1459_v54  ;;  %vm1397_vm8 = vcmp.gt.f32.partialorder %v1763_v55, 0.0  ;;  %v1430_v56 = vmul.f32 %v1763_v55, %v2199_v36  ;;  %v1252_v57 = vpop.f32.mrb[37].mxu0 }
 0x1df   :  { %vm1396_vm9 = vcmp.gt.f32.partialorder %v1252_v57, 0.0  ;;  %v1429_v58 = vmul.f32 %v2199_v36, %v1252_v57 }
 0x1e0   :  { %v1462_v59 = vsel %vm1397_vm8, %v1763_v55, %v1430_v56 }
 0x1e1   :  { %1494 = vst.msk [vmem:[%s2365_s4 + $0x28] sm:$0xff] %vm23_vm0, %v1462_v59  ;;  %v1461_v60 = vsel %vm1396_vm9, %v1252_v57, %v1429_v58  ;;  %v1766_v61 = vpop.f32.mrb[38].mxu0 }
 0x1e2   :  { %1493 = vst.msk [vmem:[%s2365_s4 + $0x20] sm:$0xff] %vm23_vm0, %v1461_v60  ;;  %vm1399_vm10 = vcmp.gt.f32.partialorder %v1766_v61, 0.0  ;;  %v1432_v62 = vmul.f32 %v1766_v61, %v2199_v36  ;;  %v1262_v63 = vpop.f32.mrb[39].mxu0 }
 0x1e3   :  { %vm1398_vm11 = vcmp.gt.f32.partialorder %v1262_v63, 0.0  ;;  %v1431_v1 = vmul.f32 %v2199_v36, %v1262_v63 }
 0x1e4   :  { %v1464_v2 = vsel %vm1399_vm10, %v1766_v61, %v1432_v62 }
 0x1e5   :  { %1496 = vst.msk [vmem:[%s2365_s4 + $0x38] sm:$0xff] %vm23_vm0, %v1464_v2  ;;  %v1463_v0 = vsel %vm1398_vm11, %v1262_v63, %v1431_v1  ;;  %v1769_v3 = vpop.f32.mrb[40].mxu0 }
 0x1e6   :  { %1495 = vst.msk [vmem:[%s2365_s4 + $0x30] sm:$0xff] %vm23_vm0, %v1463_v0  ;;  %vm1401_vm12 = vcmp.gt.f32.partialorder %v1769_v3, 0.0  ;;  %v1434_v4 = vmul.f32 %v1769_v3, %v2199_v36  ;;  %v1272_v5 = vpop.f32.mrb[41].mxu0 }
 0x1e7   :  { %vm1400_vm13 = vcmp.gt.f32.partialorder %v1272_v5, 0.0  ;;  %v1433_v6 = vmul.f32 %v2199_v36, %v1272_v5 }
 0x1e8   :  { %v1466_v7 = vsel %vm1401_vm12, %v1769_v3, %v1434_v4 }
 0x1e9   :  { %1498 = vst.msk [vmem:[%s2365_s4 + $0x48] sm:$0xff] %vm23_vm0, %v1466_v7  ;;  %v1465_v8 = vsel %vm1400_vm13, %v1272_v5, %v1433_v6  ;;  %v1772_v9 = vpop.f32.mrb[42].mxu0  ;;  %v1784_v10 = vpop.f32.mrb[34].mxu1 }
 0x1ea   :  { %1497 = vst.msk [vmem:[%s2365_s4 + $0x40] sm:$0xff] %vm23_vm0, %v1465_v8  ;;  %vm1403_vm14 = vcmp.gt.f32.partialorder %v1772_v9, 0.0  ;;  %v1436_v11 = vmul.f32 %v1772_v9, %v2199_v36  ;;  %vm1411_vm15 = vcmp.gt.f32.partialorder %v1784_v10, 0.0  ;;  %v1444_v12 = vmul.f32 %v1784_v10, %v2199_v36  ;;  %v1282_v13 = vpop.f32.mrb[43].mxu0  ;;  %v1322_v14 = vpop.f32.mrb[35].mxu1 }
 0x1eb   :  { %vm1402_vm1 = vcmp.gt.f32.partialorder %v1282_v13, 0.0  ;;  %v1435_v15 = vmul.f32 %v2199_v36, %v1282_v13  ;;  %vm1410_vm2 = vcmp.gt.f32.partialorder %v1322_v14, 0.0  ;;  %v1443_v16 = vmul.f32 %v2199_v36, %v1322_v14 }
 0x1ec   :  { %v1468_v17 = vsel %vm1403_vm14, %v1772_v9, %v1436_v11  ;;  %v1476_v18 = vsel %vm1411_vm15, %v1784_v10, %v1444_v12 }
 0x1ed   :  { %1500 = vst.msk [vmem:[%s2365_s4 + $0x58] sm:$0xff] %vm23_vm0, %v1468_v17  ;;  %1508 = vst.msk [vmem:[%s2365_s4 + $0x98] sm:$0xff] %vm23_vm0, %v1476_v18  ;;  %v1467_v19 = vsel %vm1402_vm1, %v1282_v13, %v1435_v15  ;;  %v1475_v20 = vsel %vm1410_vm2, %v1322_v14, %v1443_v16  ;;  %v1775_v21 = vpop.f32.mrb[44].mxu0  ;;  %v1787_v22 = vpop.f32.mrb[36].mxu1 }
 0x1ee   :  { %1499 = vst.msk [vmem:[%s2365_s4 + $0x50] sm:$0xff] %vm23_vm0, %v1467_v19  ;;  %1507 = vst.msk [vmem:[%s2365_s4 + $0x90] sm:$0xff] %vm23_vm0, %v1475_v20  ;;  %vm1405_vm3 = vcmp.gt.f32.partialorder %v1775_v21, 0.0  ;;  %v1438_v23 = vmul.f32 %v1775_v21, %v2199_v36  ;;  %vm1413_vm4 = vcmp.gt.f32.partialorder %v1787_v22, 0.0  ;;  %v1446_v24 = vmul.f32 %v1787_v22, %v2199_v36  ;;  %v1292_v25 = vpop.f32.mrb[45].mxu0  ;;  %v1332_v26 = vpop.f32.mrb[37].mxu1 }
 0x1ef   :  { %vm1404_vm5 = vcmp.gt.f32.partialorder %v1292_v25, 0.0  ;;  %v1437_v27 = vmul.f32 %v2199_v36, %v1292_v25  ;;  %vm1412_vm6 = vcmp.gt.f32.partialorder %v1332_v26, 0.0  ;;  %v1445_v28 = vmul.f32 %v2199_v36, %v1332_v26 }
 0x1f0   :  { %v1470_v29 = vsel %vm1405_vm3, %v1775_v21, %v1438_v23  ;;  %v1478_v30 = vsel %vm1413_vm4, %v1787_v22, %v1446_v24 }
 0x1f1   :  { %1502 = vst.msk [vmem:[%s2365_s4 + $0x68] sm:$0xff] %vm23_vm0, %v1470_v29  ;;  %1510 = vst.msk [vmem:[%s2365_s4 + $0xa8] sm:$0xff] %vm23_vm0, %v1478_v30  ;;  %v1469_v31 = vsel %vm1404_vm5, %v1292_v25, %v1437_v27  ;;  %v1477_v32 = vsel %vm1412_vm6, %v1332_v26, %v1445_v28  ;;  %v1778_v33 = vpop.f32.mrb[46].mxu0  ;;  %v1790_v34 = vpop.f32.mrb[38].mxu1 }
 0x1f2   :  { %1501 = vst.msk [vmem:[%s2365_s4 + $0x60] sm:$0xff] %vm23_vm0, %v1469_v31  ;;  %1509 = vst.msk [vmem:[%s2365_s4 + $0xa0] sm:$0xff] %vm23_vm0, %v1477_v32  ;;  %vm1407_vm7 = vcmp.gt.f32.partialorder %v1778_v33, 0.0  ;;  %v1440_v35 = vmul.f32 %v1778_v33, %v2199_v36  ;;  %vm1415_vm8 = vcmp.gt.f32.partialorder %v1790_v34, 0.0  ;;  %v1448_v37 = vmul.f32 %v1790_v34, %v2199_v36  ;;  %v1302_v38 = vpop.f32.mrb[47].mxu0  ;;  %v1342_v39 = vpop.f32.mrb[39].mxu1 }
 0x1f3   :  { %vm1406_vm9 = vcmp.gt.f32.partialorder %v1302_v38, 0.0  ;;  %v1439_v40 = vmul.f32 %v2199_v36, %v1302_v38  ;;  %vm1414_vm10 = vcmp.gt.f32.partialorder %v1342_v39, 0.0  ;;  %v1447_v41 = vmul.f32 %v2199_v36, %v1342_v39 }
 0x1f4   :  { %v1472_v42 = vsel %vm1407_vm7, %v1778_v33, %v1440_v35  ;;  %v1480_v43 = vsel %vm1415_vm8, %v1790_v34, %v1448_v37 }
 0x1f5   :  { %1504 = vst.msk [vmem:[%s2365_s4 + $0x78] sm:$0xff] %vm23_vm0, %v1472_v42  ;;  %1512 = vst.msk [vmem:[%s2365_s4 + $0xb8] sm:$0xff] %vm23_vm0, %v1480_v43  ;;  %v1471_v44 = vsel %vm1406_vm9, %v1302_v38, %v1439_v40  ;;  %v1479_v45 = vsel %vm1414_vm10, %v1342_v39, %v1447_v41  ;;  %v1793_v46 = vpop.f32.mrb[40].mxu1 }
 0x1f6   :  { %1503 = vst.msk [vmem:[%s2365_s4 + $0x70] sm:$0xff] %vm23_vm0, %v1471_v44  ;;  %1511 = vst.msk [vmem:[%s2365_s4 + $0xb0] sm:$0xff] %vm23_vm0, %v1479_v45  ;;  %vm1417_vm11 = vcmp.gt.f32.partialorder %v1793_v46, 0.0  ;;  %v1450_v47 = vmul.f32 %v1793_v46, %v2199_v36  ;;  %v1352_v48 = vpop.f32.mrb[41].mxu1 }
 0x1f7   :  { %vm1416_vm12 = vcmp.gt.f32.partialorder %v1352_v48, 0.0  ;;  %v1449_v49 = vmul.f32 %v2199_v36, %v1352_v48 }
 0x1f8   :  { %v1482_v50 = vsel %vm1417_vm11, %v1793_v46, %v1450_v47 }
 0x1f9   :  { %1514 = vst.msk [vmem:[%s2365_s4 + $0xc8] sm:$0xff] %vm23_vm0, %v1482_v50  ;;  %v1481_v51 = vsel %vm1416_vm12, %v1352_v48, %v1449_v49  ;;  %v1796_v52 = vpop.f32.mrb[42].mxu1 }
 0x1fa   :  { %1513 = vst.msk [vmem:[%s2365_s4 + $0xc0] sm:$0xff] %vm23_vm0, %v1481_v51  ;;  %vm1419_vm13 = vcmp.gt.f32.partialorder %v1796_v52, 0.0  ;;  %v1452_v53 = vmul.f32 %v1796_v52, %v2199_v36  ;;  %v1362_v54 = vpop.f32.mrb[43].mxu1 }
 0x1fb   :  { %vm1418_vm14 = vcmp.gt.f32.partialorder %v1362_v54, 0.0  ;;  %v1451_v55 = vmul.f32 %v2199_v36, %v1362_v54 }
 0x1fc   :  { %v1484_v56 = vsel %vm1419_vm13, %v1796_v52, %v1452_v53 }
 0x1fd   :  { %1516 = vst.msk [vmem:[%s2365_s4 + $0xd8] sm:$0xff] %vm23_vm0, %v1484_v56  ;;  %v1483_v57 = vsel %vm1418_vm14, %v1362_v54, %v1451_v55  ;;  %v1799_v58 = vpop.f32.mrb[44].mxu1 }
 0x1fe   :  { %1515 = vst.msk [vmem:[%s2365_s4 + $0xd0] sm:$0xff] %vm23_vm0, %v1483_v57  ;;  %vm1421_vm15 = vcmp.gt.f32.partialorder %v1799_v58, 0.0  ;;  %v1454_v59 = vmul.f32 %v1799_v58, %v2199_v36  ;;  %v1372_v60 = vpop.f32.mrb[45].mxu1 }
 0x1ff   :  { %vm1420_vm1 = vcmp.gt.f32.partialorder %v1372_v60, 0.0  ;;  %v1453_v61 = vmul.f32 %v2199_v36, %v1372_v60 }
 0x200   :  { %v1486_v62 = vsel %vm1421_vm15, %v1799_v58, %v1454_v59 }
 0x201   :  { %1518 = vst.msk [vmem:[%s2365_s4 + $0xe8] sm:$0xff] %vm23_vm0, %v1486_v62  ;;  %v1485_v63 = vsel %vm1420_vm1, %v1372_v60, %v1453_v61  ;;  %v1802_v1 = vpop.f32.mrb[46].mxu1 }
 0x202   :  { %1517 = vst.msk [vmem:[%s2365_s4 + $0xe0] sm:$0xff] %vm23_vm0, %v1485_v63  ;;  %vm1423_vm2 = vcmp.gt.f32.partialorder %v1802_v1, 0.0  ;;  %v1456_v2 = vmul.f32 %v1802_v1, %v2199_v36  ;;  %v1382_v0 = vpop.f32.mrb[47].mxu1 }
 0x203   :  { %vm1422_vm3 = vcmp.gt.f32.partialorder %v1382_v0, 0.0  ;;  %v1455_v3 = vmul.f32 %v2199_v36, %v1382_v0 }
 0x204   :  { %v1488_v4 = vsel %vm1423_vm2, %v1802_v1, %v1456_v2 }
 0x205   :  { %1520 = vst.msk [vmem:[%s2365_s4 + $0xf8] sm:$0xff] %vm23_vm0, %v1488_v4  ;;  %v1487_v5 = vsel %vm1422_vm3, %v1382_v0, %v1455_v3 }
 0x206   :  { %1519 = vst.msk [vmem:[%s2365_s4 + $0xf0] sm:$0xff] %vm23_vm0, %v1487_v5 }

// kernel: sparse_graph_convolution.3
= control target key start
LH: loop header
LB: loop body
LE: loop exit
PB: predicated region body
PF: predicated region fallthrough
CT: control target
= control target key end

     0   :  { %vm157_vm0 = vcmask 1043456   ;;  %v2669_v2 = vmov 0.0   ;;  %vm2670_vm1 = vmmov 0   ;;  %vm153_vm2 = vcmask 64512   ;;  %s3266_s0 = inlined_call_operand.<no memory space> [shape: f32[1], index: 0, kind: input, shape index: {}]   ;;  %s3267_s1 = inlined_call_operand.vmem [shape: f32[16,2,8,8], index: 1, kind: input, shape index: {}]   ;;  %s3268_s2 = inlined_call_operand.vmem [shape: bf16[16,2,8,16], index: 2, kind: input, shape index: {}]   ;;  %s3269_s3 = inlined_call_operand.vmem [shape: f32[16,16], index: 3, kind: input, shape index: {}]   ;;  %s3270_s4 = inlined_call_operand.hbm [shape: f32[16,2,8,16], index: 4, kind: output, shape index: {}]  }
   0x1   :  { %v57_v0 = vld [vmem:[%s3268_s2] sm:$0xf]  ;;  %2390 = vmatprep.subr.bf16.mxu0 %v2669_v2  ;;  %2396 = vmatprep.subr.bf16.mxu1 %v2669_v2  ;;  %v59_v4 = vld [vmem:[%s3268_s2 + $0x8] sm:$0xf]  ;;  %v61_v6 = vld [vmem:[%s3268_s2 + $0x10] sm:$0xf] }
   0x2   :  { %v89_v1 = vld [vmem:[%s3267_s1] sm:$0xff]  ;;  %v159_v3 = vsel %vm157_vm0, %v57_v0, 0  ;;  %2392 = vmatprep.mubr.msk.bf16.mxu0 %vm2670_vm1, %v2669_v2  ;;  %v205_v7 = vsel %vm157_vm0, %v59_v4, 0  ;;  %v91_v8 = vld [vmem:[%s3267_s1 + $0x10] sm:$0xff]  ;;  %v63_v9 = vld [vmem:[%s3268_s2 + $0x18] sm:$0xf]  ;;  %2398 = vmatprep.mubr.msk.bf16.mxu1 %vm2670_vm1, %v2669_v2 }
   0x3   :  { %v121_v5 = vpack.c.bf16 %v89_v1, %v89_v1  ;;  %2391 = vmatpush3.bf16.msra.mxu0 %v159_v3  ;;  %2397 = vmatpush3.bf16.msra.mxu1 %v205_v7  ;;  %v251_v10 = vsel %vm157_vm0, %v61_v6, 0  ;;  %v123_v11 = vpack.c.bf16 %v91_v8, %v91_v8  ;;  %v297_v12 = vsel %vm157_vm0, %v63_v9, 0  ;;  %v93_v13 = vld [vmem:[%s3267_s1 + $0x20] sm:$0xff]  ;;  %v95_v14 = vld [vmem:[%s3267_s1 + $0x30] sm:$0xff]  ;;  %v67_v17 = vld [vmem:[%s3268_s2 + $0x28] sm:$0xf] }
   0x4   :  { %2402 = vmatprep.subr.bf16.mxu0 %v2669_v2  ;;  %2408 = vmatprep.subr.bf16.mxu1 %v2669_v2  ;;  %v65_v15 = vld [vmem:[%s3268_s2 + $0x20] sm:$0xf]  ;;  %v125_v16 = vpack.c.bf16 %v93_v13, %v93_v13  ;;  %v127_v18 = vpack.c.bf16 %v95_v14, %v95_v14  ;;  %v389_v20 = vsel %vm157_vm0, %v67_v17, 0  ;;  %v99_v22 = vld [vmem:[%s3267_s1 + $0x50] sm:$0xff]  ;;  %v71_v25 = vld [vmem:[%s3268_s2 + $0x38] sm:$0xf] }
   0x5   :  { %v343_v19 = vsel %vm157_vm0, %v65_v15, 0  ;;  %v97_v21 = vld [vmem:[%s3267_s1 + $0x40] sm:$0xff]  ;;  %v69_v23 = vld [vmem:[%s3268_s2 + $0x30] sm:$0xf]  ;;  %v131_v26 = vpack.c.bf16 %v99_v22, %v99_v22  ;;  %v481_v28 = vsel %vm157_vm0, %v71_v25, 0  ;;  %vm24_vm3 = vcmask 130048  }
   0x6   :  { %2393 = vmatmul.mubr.msk.bf16.vlgmr.msra.gmra.mrb[0].mxu0 %vm153_vm2, %v121_v5  ;;  %2399 = vmatmul.mubr.msk.bf16.vlgmr.msra.gmra.mrb[0].mxu1 %vm153_vm2, %v123_v11  ;;  %v129_v24 = vpack.c.bf16 %v97_v21, %v97_v21  ;;  %v435_v27 = vsel %vm157_vm0, %v69_v23, 0  ;;  %v101_v29 = vld [vmem:[%s3267_s1 + $0x60] sm:$0xff]  ;;  %25 = vst.msk [vmem:[#allocation2] sm:$0xff] %vm24_vm3, %v2669_v2  ;;  %26 = vst.msk [vmem:[#allocation2 + $0x8] sm:$0xff] %vm24_vm3, %v2669_v2 }
   0x7   :  { %2403 = vmatpush3.bf16.msra.mxu0 %v251_v10  ;;  %2409 = vmatpush3.bf16.msra.mxu1 %v297_v12  ;;  %27 = vst.msk [vmem:[#allocation2 + $0x10] sm:$0xff] %vm24_vm3, %v2669_v2  ;;  %28 = vst.msk [vmem:[#allocation2 + $0x18] sm:$0xff] %vm24_vm3, %v2669_v2 }
   0x8   :  { %2404 = vmatprep.mubr.msk.bf16.mxu0 %vm2670_vm1, %v2669_v2  ;;  %2414 = vmatprep.subr.bf16.mxu0 %v2669_v2  ;;  %29 = vst.msk [vmem:[#allocation2 + $0x20] sm:$0xff] %vm24_vm3, %v2669_v2  ;;  %30 = vst.msk [vmem:[#allocation2 + $0x28] sm:$0xff] %vm24_vm3, %v2669_v2 }
   0x9   :  { %2410 = vmatprep.mubr.msk.bf16.mxu1 %vm2670_vm1, %v2669_v2  ;;  %2420 = vmatprep.subr.bf16.mxu1 %v2669_v2  ;;  %31 = vst.msk [vmem:[#allocation2 + $0x30] sm:$0xff] %vm24_vm3, %v2669_v2  ;;  %32 = vst.msk [vmem:[#allocation2 + $0x38] sm:$0xff] %vm24_vm3, %v2669_v2 }
   0xa   :  { %33 = vst.msk [vmem:[#allocation2 + $0x40] sm:$0xff] %vm24_vm3, %v2669_v2  ;;  %34 = vst.msk [vmem:[#allocation2 + $0x48] sm:$0xff] %vm24_vm3, %v2669_v2 }
   0xb   :  { %35 = vst.msk [vmem:[#allocation2 + $0x50] sm:$0xff] %vm24_vm3, %v2669_v2  ;;  %36 = vst.msk [vmem:[#allocation2 + $0x58] sm:$0xff] %vm24_vm3, %v2669_v2 }
   0xc   :  { %37 = vst.msk [vmem:[#allocation2 + $0x60] sm:$0xff] %vm24_vm3, %v2669_v2  ;;  %38 = vst.msk [vmem:[#allocation2 + $0x68] sm:$0xff] %vm24_vm3, %v2669_v2 }
   0xd   :  { %39 = vst.msk [vmem:[#allocation2 + $0x70] sm:$0xff] %vm24_vm3, %v2669_v2  ;;  %40 = vst.msk [vmem:[#allocation2 + $0x78] sm:$0xff] %vm24_vm3, %v2669_v2 }
   0xe   :  { %2405 = vmatmul.mubr.msk.bf16.vlgmr.msra.gmra.mrb[4].mxu0 %vm153_vm2, %v125_v16  ;;  %2411 = vmatmul.mubr.msk.bf16.vlgmr.msra.gmra.mrb[4].mxu1 %vm153_vm2, %v127_v18  ;;  %41 = vst.msk [vmem:[#allocation2 + $0x80] sm:$0xff] %vm24_vm3, %v2669_v2  ;;  %42 = vst.msk [vmem:[#allocation2 + $0x88] sm:$0xff] %vm24_vm3, %v2669_v2 }
   0xf   :  { %2415 = vmatpush3.bf16.msra.mxu0 %v343_v19  ;;  %2421 = vmatpush3.bf16.msra.mxu1 %v389_v20  ;;  %43 = vst.msk [vmem:[#allocation2 + $0x90] sm:$0xff] %vm24_vm3, %v2669_v2  ;;  %44 = vst.msk [vmem:[#allocation2 + $0x98] sm:$0xff] %vm24_vm3, %v2669_v2 }
  0x10   :  { %2416 = vmatprep.mubr.msk.bf16.mxu0 %vm2670_vm1, %v2669_v2  ;;  %2426 = vmatprep.subr.bf16.mxu0 %v2669_v2  ;;  %45 = vst.msk [vmem:[#allocation2 + $0xa0] sm:$0xff] %vm24_vm3, %v2669_v2  ;;  %46 = vst.msk [vmem:[#allocation2 + $0xa8] sm:$0xff] %vm24_vm3, %v2669_v2 }
  0x11   :  { %2422 = vmatprep.mubr.msk.bf16.mxu1 %vm2670_vm1, %v2669_v2  ;;  %2432 = vmatprep.subr.bf16.mxu1 %v2669_v2  ;;  %47 = vst.msk [vmem:[#allocation2 + $0xb0] sm:$0xff] %vm24_vm3, %v2669_v2  ;;  %48 = vst.msk [vmem:[#allocation2 + $0xb8] sm:$0xff] %vm24_vm3, %v2669_v2 }
  0x12   :  { %49 = vst.msk [vmem:[#allocation2 + $0xc0] sm:$0xff] %vm24_vm3, %v2669_v2  ;;  %50 = vst.msk [vmem:[#allocation2 + $0xc8] sm:$0xff] %vm24_vm3, %v2669_v2 }
  0x13   :  { %51 = vst.msk [vmem:[#allocation2 + $0xd0] sm:$0xff] %vm24_vm3, %v2669_v2  ;;  %52 = vst.msk [vmem:[#allocation2 + $0xd8] sm:$0xff] %vm24_vm3, %v2669_v2 }
  0x14   :  { %53 = vst.msk [vmem:[#allocation2 + $0xe0] sm:$0xff] %vm24_vm3, %v2669_v2  ;;  %54 = vst.msk [vmem:[#allocation2 + $0xe8] sm:$0xff] %vm24_vm3, %v2669_v2 }
  0x15   :  { %55 = vst.msk [vmem:[#allocation2 + $0xf0] sm:$0xff] %vm24_vm3, %v2669_v2  ;;  %56 = vst.msk [vmem:[#allocation2 + $0xf8] sm:$0xff] %vm24_vm3, %v2669_v2 }
  0x16   :  { %2417 = vmatmul.mubr.msk.bf16.vlgmr.msra.gmra.mrb[8].mxu0 %vm153_vm2, %v129_v24  ;;  %2423 = vmatmul.mubr.msk.bf16.vlgmr.msra.gmra.mrb[8].mxu1 %vm153_vm2, %v131_v26 }
  0x17   :  { %2427 = vmatpush3.bf16.msra.mxu0 %v435_v27 }
  0x18   :  { %10 = vsyncpa [#allocation5], 0  ;;  %2433 = vmatpush3.bf16.msra.mxu1 %v481_v28  ;;  %2428 = vmatprep.mubr.msk.bf16.mxu0 %vm2670_vm1, %v2669_v2  ;;  %v103_v30 = vld [vmem:[%s3267_s1 + $0x70] sm:$0xff]  ;;  %v73_v31 = vld [vmem:[%s3268_s2 + $0x40] sm:$0xf]  ;;  %v133_v32 = vpack.c.bf16 %v101_v29, %v101_v29 }
  0x19   :  { %2438 = vmatprep.subr.bf16.mxu0 %v2669_v2  ;;  %2434 = vmatprep.mubr.msk.bf16.mxu1 %vm2670_vm1, %v2669_v2  ;;  %v75_v33 = vld [vmem:[%s3268_s2 + $0x48] sm:$0xf]  ;;  %v135_v34 = vpack.c.bf16 %v103_v30, %v103_v30  ;;  %v527_v35 = vsel %vm157_vm0, %v73_v31, 0  ;;  %v105_v37 = vld [vmem:[%s3267_s1 + $0x80] sm:$0xff]  ;;  %v107_v38 = vld [vmem:[%s3267_s1 + $0x90] sm:$0xff] }
  0x1a   :  { %2444 = vmatprep.subr.bf16.mxu1 %v2669_v2  ;;  %v573_v36 = vsel %vm157_vm0, %v75_v33, 0  ;;  %v77_v39 = vld [vmem:[%s3268_s2 + $0x50] sm:$0xf]  ;;  %v137_v40 = vpack.c.bf16 %v105_v37, %v105_v37  ;;  %v79_v41 = vld [vmem:[%s3268_s2 + $0x58] sm:$0xf]  ;;  %v139_v42 = vpack.c.bf16 %v107_v38, %v107_v38  ;;  %v109_v45 = vld [vmem:[%s3267_s1 + $0xa0] sm:$0xff] }
  0x1b   :  { %v619_v43 = vsel %vm157_vm0, %v77_v39, 0  ;;  %v665_v44 = vsel %vm157_vm0, %v79_v41, 0  ;;  %v111_v46 = vld [vmem:[%s3267_s1 + $0xb0] sm:$0xff]  ;;  %v81_v47 = vld [vmem:[%s3268_s2 + $0x60] sm:$0xf]  ;;  %v141_v48 = vpack.c.bf16 %v109_v45, %v109_v45  ;;  %v90_v6 = vld [vmem:[%s3267_s1 + $0x8] sm:$0xff] }
  0x1c   :  { %v83_v49 = vld [vmem:[%s3268_s2 + $0x68] sm:$0xf]  ;;  %v143_v50 = vpack.c.bf16 %v111_v46, %v111_v46  ;;  %v711_v51 = vsel %vm157_vm0, %v81_v47, 0  ;;  %v113_v53 = vld [vmem:[%s3267_s1 + $0xc0] sm:$0xff]  ;;  %v115_v54 = vld [vmem:[%s3267_s1 + $0xd0] sm:$0xff]  ;;  %v122_v9 = vpack.c.bf16 %v90_v6, %v90_v6 }
  0x1d   :  { %v757_v52 = vsel %vm157_vm0, %v83_v49, 0  ;;  %v85_v55 = vld [vmem:[%s3268_s2 + $0x70] sm:$0xf]  ;;  %v145_v56 = vpack.c.bf16 %v113_v53, %v113_v53  ;;  %v87_v57 = vld [vmem:[%s3268_s2 + $0x78] sm:$0xf]  ;;  %v147_v58 = vpack.c.bf16 %v115_v54, %v115_v54  ;;  %v117_v61 = vld [vmem:[%s3267_s1 + $0xe0] sm:$0xff] }
  0x1e   :  { %2429 = vmatmul.mubr.msk.bf16.vlgmr.msra.gmra.mrb[12].mxu0 %vm153_vm2, %v133_v32  ;;  %2435 = vmatmul.mubr.msk.bf16.vlgmr.msra.gmra.mrb[12].mxu1 %vm153_vm2, %v135_v34  ;;  %v803_v59 = vsel %vm157_vm0, %v85_v55, 0  ;;  %v849_v60 = vsel %vm157_vm0, %v87_v57, 0  ;;  %v119_v62 = vld [vmem:[%s3267_s1 + $0xf0] sm:$0xff]  ;;  %v58_v63 = vld [vmem:[%s3268_s2 + $0x4] sm:$0xf]  ;;  %v149_v0 = vpack.c.bf16 %v117_v61, %v117_v61  ;;  %v92_v7 = vld [vmem:[%s3267_s1 + $0x18] sm:$0xff] }
  0x1f   :  { %2439 = vmatpush3.bf16.msra.mxu0 %v527_v35  ;;  %2445 = vmatpush3.bf16.msra.mxu1 %v573_v36  ;;  %v60_v1 = vld [vmem:[%s3268_s2 + $0xc] sm:$0xf]  ;;  %v151_v3 = vpack.c.bf16 %v119_v62, %v119_v62  ;;  %v895_v4 = vsel %vm157_vm0, %v58_v63, 0  ;;  %v62_v8 = vld [vmem:[%s3268_s2 + $0x14] sm:$0xf]  ;;  %v124_v11 = vpack.c.bf16 %v92_v7, %v92_v7  ;;  %v96_v15 = vld [vmem:[%s3267_s1 + $0x38] sm:$0xff] }
  0x20   :  { %2440 = vmatprep.mubr.msk.bf16.mxu0 %vm2670_vm1, %v2669_v2  ;;  %2450 = vmatprep.subr.bf16.mxu0 %v2669_v2  ;;  %v941_v5 = vsel %vm157_vm0, %v60_v1, 0  ;;  %v64_v10 = vld [vmem:[%s3268_s2 + $0x1c] sm:$0xf]  ;;  %v987_v12 = vsel %vm157_vm0, %v62_v8, 0  ;;  %v94_v14 = vld [vmem:[%s3267_s1 + $0x28] sm:$0xff]  ;;  %v128_v19 = vpack.c.bf16 %v96_v15, %v96_v15  ;;  %v1629_v6 = vld [vmem:[#allocation2 + $0x10] sm:$0xff] }
  0x21   :  { %2446 = vmatprep.mubr.msk.bf16.mxu1 %vm2670_vm1, %v2669_v2  ;;  %2456 = vmatprep.subr.bf16.mxu1 %v2669_v2  ;;  %v1033_v13 = vsel %vm157_vm0, %v64_v10, 0  ;;  %v66_v16 = vld [vmem:[%s3268_s2 + $0x24] sm:$0xf]  ;;  %v126_v17 = vpack.c.bf16 %v94_v14, %v94_v14  ;;  %v68_v18 = vld [vmem:[%s3268_s2 + $0x2c] sm:$0xf]  ;;  %v100_v23 = vld [vmem:[%s3267_s1 + $0x58] sm:$0xff] }
  0x22   :  { %v1079_v20 = vsel %vm157_vm0, %v66_v16, 0  ;;  %v1125_v21 = vsel %vm157_vm0, %v68_v18, 0  ;;  %v98_v22 = vld [vmem:[%s3267_s1 + $0x48] sm:$0xff]  ;;  %v70_v24 = vld [vmem:[%s3268_s2 + $0x34] sm:$0xf]  ;;  %v132_v27 = vpack.c.bf16 %v100_v23, %v100_v23  ;;  %v104_v31 = vld [vmem:[%s3267_s1 + $0x78] sm:$0xff] }
  0x23   :  { %v130_v25 = vpack.c.bf16 %v98_v22, %v98_v22  ;;  %v72_v26 = vld [vmem:[%s3268_s2 + $0x3c] sm:$0xf]  ;;  %v1171_v28 = vsel %vm157_vm0, %v70_v24, 0  ;;  %v102_v30 = vld [vmem:[%s3267_s1 + $0x68] sm:$0xff]  ;;  %v74_v32 = vld [vmem:[%s3268_s2 + $0x44] sm:$0xf]  ;;  %v136_v35 = vpack.c.bf16 %v104_v31, %v104_v31 }
  0x24   :  { %v1217_v29 = vsel %vm157_vm0, %v72_v26, 0  ;;  %v134_v33 = vpack.c.bf16 %v102_v30, %v102_v30  ;;  %v76_v34 = vld [vmem:[%s3268_s2 + $0x4c] sm:$0xf]  ;;  %v1263_v36 = vsel %vm157_vm0, %v74_v32, 0  ;;  %v108_v39 = vld [vmem:[%s3267_s1 + $0x98] sm:$0xff]  ;;  %v1633_v18 = vld [vmem:[#allocation2 + $0x30] sm:$0xff] }
  0x25   :  { %v1309_v37 = vsel %vm157_vm0, %v76_v34, 0  ;;  %v106_v38 = vld [vmem:[%s3267_s1 + $0x88] sm:$0xff]  ;;  %v112_v47 = vld [vmem:[%s3267_s1 + $0xb8] sm:$0xff]  ;;  %v1635_v30 = vld [vmem:[#allocation2 + $0x40] sm:$0xff] }
  0x26   :  { %2441 = vmatmul.mubr.msk.bf16.vlgmr.msra.gmra.mrb[16].mxu0 %vm153_vm2, %v137_v40  ;;  %2447 = vmatmul.mubr.msk.bf16.vlgmr.msra.gmra.mrb[16].mxu1 %vm153_vm2, %v139_v42  ;;  %v78_v40 = vld [vmem:[%s3268_s2 + $0x54] sm:$0xf]  ;;  %v138_v41 = vpack.c.bf16 %v106_v38, %v106_v38  ;;  %v80_v42 = vld [vmem:[%s3268_s2 + $0x5c] sm:$0xf]  ;;  %v110_v46 = vld [vmem:[%s3267_s1 + $0xa8] sm:$0xff] }
  0x27   :  { %2451 = vmatpush3.bf16.msra.mxu0 %v619_v43  ;;  %2457 = vmatpush3.bf16.msra.mxu1 %v665_v44  ;;  %v140_v43 = vpack.c.bf16 %v108_v39, %v108_v39  ;;  %v1355_v44 = vsel %vm157_vm0, %v78_v40, 0  ;;  %v1401_v45 = vsel %vm157_vm0, %v80_v42, 0  ;;  %v142_v49 = vpack.c.bf16 %v110_v46, %v110_v46  ;;  %v114_v54 = vld [vmem:[%s3267_s1 + $0xc8] sm:$0xff]  ;;  %v116_v55 = vld [vmem:[%s3267_s1 + $0xd8] sm:$0xff]  ;;  %v1637_v31 = vld [vmem:[#allocation2 + $0x50] sm:$0xff] }
  0x28   :  { %2452 = vmatprep.mubr.msk.bf16.mxu0 %vm2670_vm1, %v2669_v2  ;;  %2462 = vmatprep.subr.bf16.mxu0 %v2669_v2  ;;  %v146_v57 = vpack.c.bf16 %v114_v54, %v114_v54  ;;  %v118_v62 = vld [vmem:[%s3267_s1 + $0xe8] sm:$0xff]  ;;  %v120_v63 = vld [vmem:[%s3267_s1 + $0xf8] sm:$0xff]  ;;  %v1639_v42 = vld [vmem:[#allocation2 + $0x60] sm:$0xff] }
  0x29   :  { %2458 = vmatprep.mubr.msk.bf16.mxu1 %vm2670_vm1, %v2669_v2  ;;  %2468 = vmatprep.subr.bf16.mxu1 %v2669_v2  ;;  %v152_v1 = vpack.c.bf16 %v120_v63, %v120_v63  ;;  %v1643_v54 = vld [vmem:[#allocation2 + $0x80] sm:$0xff] }
  0x2e   :  { %2453 = vmatmul.mubr.msk.bf16.vlgmr.msra.gmra.mrb[20].mxu0 %vm153_vm2, %v141_v48  ;;  %2459 = vmatmul.mubr.msk.bf16.vlgmr.msra.gmra.mrb[20].mxu1 %vm153_vm2, %v143_v50  ;;  %v82_v48 = vld [vmem:[%s3268_s2 + $0x64] sm:$0xf]  ;;  %v84_v50 = vld [vmem:[%s3268_s2 + $0x6c] sm:$0xf] }
  0x2f   :  { %2463 = vmatpush3.bf16.msra.mxu0 %v711_v51  ;;  %2469 = vmatpush3.bf16.msra.mxu1 %v757_v52  ;;  %v144_v51 = vpack.c.bf16 %v112_v47, %v112_v47  ;;  %v1447_v52 = vsel %vm157_vm0, %v82_v48, 0  ;;  %v1493_v53 = vsel %vm157_vm0, %v84_v50, 0 }
  0x30   :  { %2464 = vmatprep.mubr.msk.bf16.mxu0 %vm2670_vm1, %v2669_v2  ;;  %2474 = vmatprep.subr.bf16.mxu0 %v2669_v2 }
  0x31   :  { %2470 = vmatprep.mubr.msk.bf16.mxu1 %vm2670_vm1, %v2669_v2  ;;  %2480 = vmatprep.subr.bf16.mxu1 %v2669_v2 }
  0x36   :  { %2465 = vmatmul.mubr.msk.bf16.vlgmr.msra.gmra.mrb[24].mxu0 %vm153_vm2, %v145_v56  ;;  %2471 = vmatmul.mubr.msk.bf16.vlgmr.msra.gmra.mrb[24].mxu1 %vm153_vm2, %v147_v58  ;;  %v86_v56 = vld [vmem:[%s3268_s2 + $0x74] sm:$0xf]  ;;  %v88_v58 = vld [vmem:[%s3268_s2 + $0x7c] sm:$0xf] }
  0x37   :  { %2475 = vmatpush3.bf16.msra.mxu0 %v803_v59  ;;  %2481 = vmatpush3.bf16.msra.mxu1 %v849_v60  ;;  %v148_v59 = vpack.c.bf16 %v116_v55, %v116_v55  ;;  %v1539_v60 = vsel %vm157_vm0, %v86_v56, 0  ;;  %v1585_v61 = vsel %vm157_vm0, %v88_v58, 0  ;;  %v1645_v55 = vld [vmem:[#allocation2 + $0x90] sm:$0xff] }
  0x38   :  { %2476 = vmatprep.mubr.msk.bf16.mxu0 %vm2670_vm1, %v2669_v2  ;;  %2486 = vmatprep.subr.bf16.mxu0 %v2669_v2 }
  0x39   :  { %2482 = vmatprep.mubr.msk.bf16.mxu1 %vm2670_vm1, %v2669_v2  ;;  %2492 = vmatprep.subr.bf16.mxu1 %v2669_v2 }
  0x3e   :  { %2477 = vmatmul.mubr.msk.bf16.vlgmr.msra.gmra.mrb[28].mxu0 %vm153_vm2, %v149_v0  ;;  %2483 = vmatmul.mubr.msk.bf16.vlgmr.msra.gmra.mrb[28].mxu1 %vm153_vm2, %v151_v3  ;;  %v150_v0 = vpack.c.bf16 %v118_v62, %v118_v62  ;;  %v1759_v3 = vld [vmem:[%s3269_s3] sm:$0xff] }
  0x3f   :  { %2487 = vmatpush3.bf16.msra.mxu0 %v895_v4  ;;  %2493 = vmatpush3.bf16.msra.mxu1 %v941_v5  ;;  %v1760_v4 = vld [vmem:[%s3269_s3 + $0x8] sm:$0xff] }
  0x40   :  { %2488 = vmatprep.mubr.msk.bf16.mxu0 %vm2670_vm1, %v2669_v2  ;;  %2498 = vmatprep.subr.bf16.mxu0 %v2669_v2  ;;  %v2634_v5 = vpack.c.bf16 %v1760_v4, %v1759_v3  ;;  %v1647_v3 = vld [vmem:[#allocation2 + $0xa0] sm:$0xff]  ;;  %v1649_v4 = vld [vmem:[#allocation2 + $0xb0] sm:$0xff] }
  0x41   :  { %2494 = vmatprep.mubr.msk.bf16.mxu1 %vm2670_vm1, %v2669_v2  ;;  %2504 = vmatprep.subr.bf16.mxu1 %v2669_v2 }
  0x46   :  { %2489 = vmatmul.mubr.msk.bf16.vlgmr.msra.gmra.mrb[32].mxu0 %vm153_vm2, %v122_v9  ;;  %2495 = vmatmul.mubr.msk.bf16.vlgmr.msra.gmra.mrb[32].mxu1 %vm153_vm2, %v124_v11 }
  0x47   :  { %2499 = vmatpush3.bf16.msra.mxu0 %v987_v12  ;;  %2505 = vmatpush3.bf16.msra.mxu1 %v1033_v13 }
  0x48   :  { %2500 = vmatprep.mubr.msk.bf16.mxu0 %vm2670_vm1, %v2669_v2  ;;  %2510 = vmatprep.subr.bf16.mxu0 %v2669_v2 }
  0x49   :  { %2506 = vmatprep.mubr.msk.bf16.mxu1 %vm2670_vm1, %v2669_v2  ;;  %2516 = vmatprep.subr.bf16.mxu1 %v2669_v2 }
  0x4e   :  { %2501 = vmatmul.mubr.msk.bf16.vlgmr.msra.gmra.mrb[36].mxu0 %vm153_vm2, %v126_v17  ;;  %2507 = vmatmul.mubr.msk.bf16.vlgmr.msra.gmra.mrb[36].mxu1 %vm153_vm2, %v128_v19  ;;  %v1631_v17 = vld [vmem:[#allocation2 + $0x20] sm:$0xff] }
  0x4f   :  { %2511 = vmatpush3.bf16.msra.mxu0 %v1079_v20  ;;  %2517 = vmatpush3.bf16.msra.mxu1 %v1125_v21 }
  0x50   :  { %2512 = vmatprep.mubr.msk.bf16.mxu0 %vm2670_vm1, %v2669_v2  ;;  %2522 = vmatprep.subr.bf16.mxu0 %v2669_v2 }
  0x51   :  { %2518 = vmatprep.mubr.msk.bf16.mxu1 %vm2670_vm1, %v2669_v2  ;;  %2528 = vmatprep.subr.bf16.mxu1 %v2669_v2 }
  0x56   :  { %2513 = vmatmul.mubr.msk.bf16.vlgmr.msra.gmra.mrb[40].mxu0 %vm153_vm2, %v130_v25  ;;  %2519 = vmatmul.mubr.msk.bf16.vlgmr.msra.gmra.mrb[40].mxu1 %vm153_vm2, %v132_v27 }
  0x57   :  { %2523 = vmatpush3.bf16.msra.mxu0 %v1171_v28  ;;  %2529 = vmatpush3.bf16.msra.mxu1 %v1217_v29 }
  0x58   :  { %2524 = vmatprep.mubr.msk.bf16.mxu0 %vm2670_vm1, %v2669_v2  ;;  %2534 = vmatprep.subr.bf16.mxu0 %v2669_v2 }
  0x59   :  { %2530 = vmatprep.mubr.msk.bf16.mxu1 %vm2670_vm1, %v2669_v2  ;;  %2540 = vmatprep.subr.bf16.mxu1 %v2669_v2 }
  0x5e   :  { %2525 = vmatmul.mubr.msk.bf16.vlgmr.msra.gmra.mrb[44].mxu0 %vm153_vm2, %v134_v33  ;;  %2531 = vmatmul.mubr.msk.bf16.vlgmr.msra.gmra.mrb[44].mxu1 %vm153_vm2, %v136_v35 }
  0x5f   :  { %2535 = vmatpush3.bf16.msra.mxu0 %v1263_v36  ;;  %2541 = vmatpush3.bf16.msra.mxu1 %v1309_v37 }
  0x60   :  { %2536 = vmatprep.mubr.msk.bf16.mxu0 %vm2670_vm1, %v2669_v2  ;;  %2546 = vmatprep.subr.bf16.mxu0 %v2669_v2 }
  0x61   :  { %2542 = vmatprep.mubr.msk.bf16.mxu1 %vm2670_vm1, %v2669_v2  ;;  %2552 = vmatprep.subr.bf16.mxu1 %v2669_v2 }
  0x66   :  { %2537 = vmatmul.mubr.msk.bf16.vlgmr.msra.gmra.mrb[48].mxu0 %vm153_vm2, %v138_v41  ;;  %2543 = vmatmul.mubr.msk.bf16.vlgmr.msra.gmra.mrb[48].mxu1 %vm153_vm2, %v140_v43  ;;  %v1641_v43 = vld [vmem:[#allocation2 + $0x70] sm:$0xff] }
  0x67   :  { %2547 = vmatpush3.bf16.msra.mxu0 %v1355_v44  ;;  %2553 = vmatpush3.bf16.msra.mxu1 %v1401_v45 }
  0x68   :  { %2548 = vmatprep.mubr.msk.bf16.mxu0 %vm2670_vm1, %v2669_v2  ;;  %2558 = vmatprep.subr.bf16.mxu0 %v2669_v2 }
  0x69   :  { %2554 = vmatprep.mubr.msk.bf16.mxu1 %vm2670_vm1, %v2669_v2  ;;  %2564 = vmatprep.subr.bf16.mxu1 %v2669_v2 }
  0x6e   :  { %2549 = vmatmul.mubr.msk.bf16.vlgmr.msra.gmra.mrb[52].mxu0 %vm153_vm2, %v142_v49  ;;  %2555 = vmatmul.mubr.msk.bf16.vlgmr.msra.gmra.mrb[52].mxu1 %vm153_vm2, %v144_v51 }
  0x6f   :  { %2559 = vmatpush3.bf16.msra.mxu0 %v1447_v52  ;;  %2565 = vmatpush3.bf16.msra.mxu1 %v1493_v53 }
  0x70   :  { %2560 = vmatprep.mubr.msk.bf16.mxu0 %vm2670_vm1, %v2669_v2  ;;  %2570 = vmatprep.subr.bf16.mxu0 %v2669_v2 }
  0x71   :  { %2566 = vmatprep.mubr.msk.bf16.mxu1 %vm2670_vm1, %v2669_v2  ;;  %2576 = vmatprep.subr.bf16.mxu1 %v2669_v2 }
  0x76   :  { %2561 = vmatmul.mubr.msk.bf16.vlgmr.msra.gmra.mrb[56].mxu0 %vm153_vm2, %v146_v57  ;;  %2567 = vmatmul.mubr.msk.bf16.vlgmr.msra.gmra.mrb[56].mxu1 %vm153_vm2, %v148_v59 }
  0x77   :  { %2571 = vmatpush3.bf16.msra.mxu0 %v1539_v60  ;;  %2577 = vmatpush3.bf16.msra.mxu1 %v1585_v61 }
  0x78   :  { %2572 = vmatprep.mubr.msk.bf16.mxu0 %vm2670_vm1, %v2669_v2  ;;  %2578 = vmatprep.mubr.msk.bf16.mxu1 %vm2670_vm1, %v2669_v2  ;;  %v1627_v2 = vld [vmem:[#allocation2] sm:$0xff] }
  0x79   :  { %2635 = vmatprep.subr.bf16.mxu0 %v2634_v5  ;;  %2638 = vmatprep.subr.bf16.mxu1 %v2634_v5 }
  0x7e   :  { %2573 = vmatmul.mubr.msk.bf16.vlgmr.msra.gmra.mrb[60].mxu0 %vm153_vm2, %v150_v0  ;;  %2579 = vmatmul.mubr.msk.bf16.vlgmr.msra.gmra.mrb[60].mxu1 %vm153_vm2, %v152_v1 }
  0x7f   :  { %2637 = vmatpush3.bf16.msra.mxu0 %v2634_v5  ;;  %2639 = vmatpush3.bf16.msra.mxu1 %v2634_v5 }
  0xd9   :  { %v195_v7 = vpop.f32.mrb[0].mxu0  ;;  %v241_v10 = vpop.f32.mrb[0].mxu1 }
  0xda   :  { %v1659_v8 = vadd.f32 %v1627_v2, %v195_v7  ;;  %v2394_v9 = vpop.f32.mrb[1].mxu0  ;;  %v1661_v12 = vadd.f32 %v1629_v6, %v241_v10  ;;  %v2400_v13 = vpop.f32.mrb[1].mxu1 }
  0xdb   :  { %v198_v11 = vpop.f32.mrb[2].mxu0  ;;  %v244_v15 = vpop.f32.mrb[2].mxu1 }
  0xdc   :  { %1692 = vst.msk [vmem:[#allocation2] sm:$0xff] %vm24_vm3, %v1659_v8  ;;  %v2395_v14 = vpop.f32.mrb[3].mxu0  ;;  %1694 = vst.msk [vmem:[#allocation2 + $0x10] sm:$0xff] %vm24_vm3, %v1661_v12  ;;  %v2401_v16 = vpop.f32.mrb[3].mxu1  ;;  %v1651_v15 = vld [vmem:[#allocation2 + $0xc0] sm:$0xff] }
  0xdd   :  { %v1653_v16 = vld [vmem:[#allocation2 + $0xd0] sm:$0xff] }
  0xe1   :  { %v287_v19 = vpop.f32.mrb[4].mxu0  ;;  %v333_v22 = vpop.f32.mrb[4].mxu1 }
  0xe2   :  { %v1663_v20 = vadd.f32 %v1631_v17, %v287_v19  ;;  %v2406_v21 = vpop.f32.mrb[5].mxu0  ;;  %v1665_v24 = vadd.f32 %v1633_v18, %v333_v22  ;;  %v2412_v25 = vpop.f32.mrb[5].mxu1 }
  0xe3   :  { %v290_v23 = vpop.f32.mrb[6].mxu0  ;;  %v1727_v26 = vld [vmem:[#allocation2] sm:$0xff]  ;;  %v336_v28 = vpop.f32.mrb[6].mxu1 }
  0xe4   :  { %1696 = vst.msk [vmem:[#allocation2 + $0x20] sm:$0xff] %vm24_vm3, %v1663_v20  ;;  %v2407_v27 = vpop.f32.mrb[7].mxu0  ;;  %2586 = vmatprep.mubr.msk.f32.mxu0 %vm24_vm3, %v1727_v26  ;;  %1698 = vst.msk [vmem:[#allocation2 + $0x30] sm:$0xff] %vm24_vm3, %v1665_v24  ;;  %v2413_v29 = vpop.f32.mrb[7].mxu1  ;;  %v1657_v28 = vld [vmem:[#allocation2 + $0xf0] sm:$0xff] }
  0xe5   :  { %v1655_v27 = vld [vmem:[#allocation2 + $0xe0] sm:$0xff] }
  0xe9   :  { %v379_v32 = vpop.f32.mrb[8].mxu0  ;;  %v425_v35 = vpop.f32.mrb[8].mxu1 }
  0xea   :  { %v1667_v33 = vadd.f32 %v1635_v30, %v379_v32  ;;  %v2418_v34 = vpop.f32.mrb[9].mxu0  ;;  %v1669_v37 = vadd.f32 %v1637_v31, %v425_v35  ;;  %v2424_v38 = vpop.f32.mrb[9].mxu1 }
  0xeb   :  { %v382_v36 = vpop.f32.mrb[10].mxu0  ;;  %v428_v40 = vpop.f32.mrb[10].mxu1 }
  0xec   :  { %1700 = vst.msk [vmem:[#allocation2 + $0x40] sm:$0xff] %vm24_vm3, %v1667_v33  ;;  %v2419_v39 = vpop.f32.mrb[11].mxu0  ;;  %1702 = vst.msk [vmem:[#allocation2 + $0x50] sm:$0xff] %vm24_vm3, %v1669_v37  ;;  %v2425_v41 = vpop.f32.mrb[11].mxu1  ;;  %v1630_v40 = vld [vmem:[#allocation2 + $0x18] sm:$0xff] }
  0xed   :  { %v1628_v39 = vld [vmem:[#allocation2 + $0x8] sm:$0xff] }
  0xf1   :  { %v471_v44 = vpop.f32.mrb[12].mxu0  ;;  %v517_v47 = vpop.f32.mrb[12].mxu1 }
  0xf2   :  { %v1671_v45 = vadd.f32 %v1639_v42, %v471_v44  ;;  %v2430_v46 = vpop.f32.mrb[13].mxu0  ;;  %v1673_v49 = vadd.f32 %v1641_v43, %v517_v47  ;;  %v2436_v50 = vpop.f32.mrb[13].mxu1 }
  0xf3   :  { %v474_v48 = vpop.f32.mrb[14].mxu0  ;;  %v520_v52 = vpop.f32.mrb[14].mxu1 }
  0xf4   :  { %1704 = vst.msk [vmem:[#allocation2 + $0x60] sm:$0xff] %vm24_vm3, %v1671_v45  ;;  %v2431_v51 = vpop.f32.mrb[15].mxu0  ;;  %1706 = vst.msk [vmem:[#allocation2 + $0x70] sm:$0xff] %vm24_vm3, %v1673_v49  ;;  %v2437_v53 = vpop.f32.mrb[15].mxu1  ;;  %v1634_v52 = vld [vmem:[#allocation2 + $0x38] sm:$0xff] }
  0xf5   :  { %v1632_v51 = vld [vmem:[#allocation2 + $0x28] sm:$0xff] }
  0xf9   :  { %v563_v56 = vpop.f32.mrb[16].mxu0  ;;  %v609_v59 = vpop.f32.mrb[16].mxu1 }
  0xfa   :  { %v1675_v57 = vadd.f32 %v1643_v54, %v563_v56  ;;  %v2442_v58 = vpop.f32.mrb[17].mxu0  ;;  %v1677_v61 = vadd.f32 %v1645_v55, %v609_v59  ;;  %v2448_v62 = vpop.f32.mrb[17].mxu1 }
  0xfb   :  { %v566_v60 = vpop.f32.mrb[18].mxu0  ;;  %v612_v0 = vpop.f32.mrb[18].mxu1 }
  0xfc   :  { %1708 = vst.msk [vmem:[#allocation2 + $0x80] sm:$0xff] %vm24_vm3, %v1675_v57  ;;  %v2443_v63 = vpop.f32.mrb[19].mxu0  ;;  %1710 = vst.msk [vmem:[#allocation2 + $0x90] sm:$0xff] %vm24_vm3, %v1677_v61  ;;  %v2449_v1 = vpop.f32.mrb[19].mxu1 }
  0xfd   :  { %v1729_v63 = vld [vmem:[#allocation2 + $0x10] sm:$0xff] }
 0x101   :  { %v655_v5 = vpop.f32.mrb[20].mxu0  ;;  %v701_v7 = vpop.f32.mrb[20].mxu1 }
 0x102   :  { %v1679_v2 = vadd.f32 %v1647_v3, %v655_v5  ;;  %v2454_v6 = vpop.f32.mrb[21].mxu0  ;;  %v1681_v9 = vadd.f32 %v1649_v4, %v701_v7  ;;  %v2460_v10 = vpop.f32.mrb[21].mxu1  ;;  %v1636_v3 = vld [vmem:[#allocation2 + $0x48] sm:$0xff]  ;;  %v1731_v4 = vld [vmem:[#allocation2 + $0x20] sm:$0xff]  ;;  %v1638_v5 = vld [vmem:[#allocation2 + $0x58] sm:$0xff] }
 0x103   :  { %v658_v8 = vpop.f32.mrb[22].mxu0  ;;  %v1743_v11 = vld [vmem:[#allocation2 + $0x80] sm:$0xff]  ;;  %v704_v13 = vpop.f32.mrb[22].mxu1 }
 0x104   :  { %1712 = vst.msk [vmem:[#allocation2 + $0xa0] sm:$0xff] %vm24_vm3, %v1679_v2  ;;  %v2455_v12 = vpop.f32.mrb[23].mxu0  ;;  %2610 = vmatprep.mubr.msk.f32.mxu1 %vm24_vm3, %v1743_v11  ;;  %1714 = vst.msk [vmem:[#allocation2 + $0xb0] sm:$0xff] %vm24_vm3, %v1681_v9  ;;  %v2461_v14 = vpop.f32.mrb[23].mxu1 }
 0x109   :  { %v747_v17 = vpop.f32.mrb[24].mxu0  ;;  %v793_v20 = vpop.f32.mrb[24].mxu1 }
 0x10a   :  { %v1683_v18 = vadd.f32 %v1651_v15, %v747_v17  ;;  %v2466_v19 = vpop.f32.mrb[25].mxu0  ;;  %v1685_v22 = vadd.f32 %v1653_v16, %v793_v20  ;;  %v2472_v23 = vpop.f32.mrb[25].mxu1  ;;  %v1733_v15 = vld [vmem:[#allocation2 + $0x30] sm:$0xff]  ;;  %v1642_v20 = vld [vmem:[#allocation2 + $0x78] sm:$0xff] }
 0x10b   :  { %v750_v21 = vpop.f32.mrb[26].mxu0  ;;  %v796_v25 = vpop.f32.mrb[26].mxu1  ;;  %v1735_v19 = vld [vmem:[#allocation2 + $0x40] sm:$0xff] }
 0x10c   :  { %1716 = vst.msk [vmem:[#allocation2 + $0xc0] sm:$0xff] %vm24_vm3, %v1683_v18  ;;  %v2467_v24 = vpop.f32.mrb[27].mxu0  ;;  %1718 = vst.msk [vmem:[#allocation2 + $0xd0] sm:$0xff] %vm24_vm3, %v1685_v22  ;;  %v2473_v26 = vpop.f32.mrb[27].mxu1  ;;  %v1640_v18 = vld [vmem:[#allocation2 + $0x68] sm:$0xff] }
 0x111   :  { %v839_v29 = vpop.f32.mrb[28].mxu0  ;;  %v885_v32 = vpop.f32.mrb[28].mxu1 }
 0x112   :  { %v1687_v30 = vadd.f32 %v1655_v27, %v839_v29  ;;  %v2478_v31 = vpop.f32.mrb[29].mxu0  ;;  %v1689_v34 = vadd.f32 %v1657_v28, %v885_v32  ;;  %v2484_v35 = vpop.f32.mrb[29].mxu1 }
 0x113   :  { %v842_v33 = vpop.f32.mrb[30].mxu0  ;;  %v888_v37 = vpop.f32.mrb[30].mxu1  ;;  %v1737_v31 = vld [vmem:[#allocation2 + $0x50] sm:$0xff]  ;;  %v1739_v35 = vld [vmem:[#allocation2 + $0x60] sm:$0xff] }
 0x114   :  { %1720 = vst.msk [vmem:[#allocation2 + $0xe0] sm:$0xff] %vm24_vm3, %v1687_v30  ;;  %v2479_v36 = vpop.f32.mrb[31].mxu0  ;;  %1722 = vst.msk [vmem:[#allocation2 + $0xf0] sm:$0xff] %vm24_vm3, %v1689_v34  ;;  %v2485_v38 = vpop.f32.mrb[31].mxu1  ;;  %v1644_v34 = vld [vmem:[#allocation2 + $0x88] sm:$0xff] }
 0x115   :  { %v1646_v36 = vld [vmem:[#allocation2 + $0x98] sm:$0xff] }
 0x119   :  { %v931_v41 = vpop.f32.mrb[32].mxu0  ;;  %v977_v44 = vpop.f32.mrb[32].mxu1 }
 0x11a   :  { %v1660_v42 = vadd.f32 %v1628_v39, %v931_v41  ;;  %v2490_v43 = vpop.f32.mrb[33].mxu0  ;;  %v1662_v46 = vadd.f32 %v1630_v40, %v977_v44  ;;  %v2496_v47 = vpop.f32.mrb[33].mxu1 }
 0x11b   :  { %v934_v45 = vpop.f32.mrb[34].mxu0  ;;  %v980_v49 = vpop.f32.mrb[34].mxu1  ;;  %v1741_v47 = vld [vmem:[#allocation2 + $0x70] sm:$0xff] }
 0x11c   :  { %1693 = vst.msk [vmem:[#allocation2 + $0x8] sm:$0xff] %vm24_vm3, %v1660_v42  ;;  %v2491_v48 = vpop.f32.mrb[35].mxu0  ;;  %1695 = vst.msk [vmem:[#allocation2 + $0x18] sm:$0xff] %vm24_vm3, %v1662_v46  ;;  %v2497_v50 = vpop.f32.mrb[35].mxu1 }
 0x11d   :  { %v1648_v50 = vld [vmem:[#allocation2 + $0xa8] sm:$0xff] }
 0x121   :  { %v1023_v53 = vpop.f32.mrb[36].mxu0  ;;  %v1069_v56 = vpop.f32.mrb[36].mxu1 }
 0x122   :  { %v1664_v54 = vadd.f32 %v1632_v51, %v1023_v53  ;;  %v2502_v55 = vpop.f32.mrb[37].mxu0  ;;  %v1666_v58 = vadd.f32 %v1634_v52, %v1069_v56  ;;  %v2508_v59 = vpop.f32.mrb[37].mxu1  ;;  %v1650_v51 = vld [vmem:[#allocation2 + $0xb8] sm:$0xff] }
 0x123   :  { %v1026_v57 = vpop.f32.mrb[38].mxu0  ;;  %v1728_v60 = vld [vmem:[#allocation2 + $0x8] sm:$0xff]  ;;  %v1072_v62 = vpop.f32.mrb[38].mxu1  ;;  %v1730_v1 = vld [vmem:[#allocation2 + $0x18] sm:$0xff] }
 0x124   :  { %1697 = vst.msk [vmem:[#allocation2 + $0x28] sm:$0xff] %vm24_vm3, %v1664_v54  ;;  %v2503_v61 = vpop.f32.mrb[39].mxu0  ;;  %2587 = vmatmul.mubr.msk.f32.vlgmr.msra.gmra.mrb[64].mxu0 %vm24_vm3, %v1728_v60  ;;  %1699 = vst.msk [vmem:[#allocation2 + $0x38] sm:$0xff] %vm24_vm3, %v1666_v58  ;;  %v2509_v0 = vpop.f32.mrb[39].mxu1  ;;  %v1745_v62 = vld [vmem:[#allocation2 + $0x90] sm:$0xff] }
 0x125   :  { %2589 = vmatprep.mubr.msk.f32.mxu0 %vm24_vm3, %v1729_v63 }
 0x128   :  { %2590 = vmatmul.mubr.msk.f32.gmra.mrb[66].mxu0 %vm24_vm3, %v1730_v1  ;;  %v1652_v1 = vld [vmem:[#allocation2 + $0xc8] sm:$0xff] }
 0x129   :  { %v1115_v2 = vpop.f32.mrb[40].mxu0  ;;  %2592 = vmatprep.mubr.msk.f32.mxu0 %vm24_vm3, %v1731_v4  ;;  %v1161_v8 = vpop.f32.mrb[40].mxu1  ;;  %v1654_v4 = vld [vmem:[#allocation2 + $0xd8] sm:$0xff] }
 0x12a   :  { %v1668_v6 = vadd.f32 %v1636_v3, %v1115_v2  ;;  %v2514_v7 = vpop.f32.mrb[41].mxu0  ;;  %v1670_v10 = vadd.f32 %v1638_v5, %v1161_v8  ;;  %v2520_v11 = vpop.f32.mrb[41].mxu1  ;;  %v1747_v3 = vld [vmem:[#allocation2 + $0xa0] sm:$0xff] }
 0x12b   :  { %v1118_v9 = vpop.f32.mrb[42].mxu0  ;;  %v1732_v12 = vld [vmem:[#allocation2 + $0x28] sm:$0xff]  ;;  %v1164_v14 = vpop.f32.mrb[42].mxu1  ;;  %v1734_v17 = vld [vmem:[#allocation2 + $0x38] sm:$0xff] }
 0x12c   :  { %1701 = vst.msk [vmem:[#allocation2 + $0x48] sm:$0xff] %vm24_vm3, %v1668_v6  ;;  %v2515_v13 = vpop.f32.mrb[43].mxu0  ;;  %2593 = vmatmul.mubr.msk.f32.gmra.mrb[68].mxu0 %vm24_vm3, %v1732_v12  ;;  %1703 = vst.msk [vmem:[#allocation2 + $0x58] sm:$0xff] %vm24_vm3, %v1670_v10  ;;  %v2521_v16 = vpop.f32.mrb[43].mxu1  ;;  %v1749_v14 = vld [vmem:[#allocation2 + $0xb0] sm:$0xff] }
 0x12d   :  { %2595 = vmatprep.mubr.msk.f32.mxu0 %vm24_vm3, %v1733_v15 }
 0x130   :  { %2596 = vmatmul.mubr.msk.f32.gmra.mrb[70].mxu0 %vm24_vm3, %v1734_v17  ;;  %v1656_v17 = vld [vmem:[#allocation2 + $0xe8] sm:$0xff] }
 0x131   :  { %v1207_v21 = vpop.f32.mrb[44].mxu0  ;;  %2598 = vmatprep.mubr.msk.f32.mxu0 %vm24_vm3, %v1735_v19  ;;  %v1253_v24 = vpop.f32.mrb[44].mxu1  ;;  %v1658_v19 = vld [vmem:[#allocation2 + $0xf8] sm:$0xff] }
 0x132   :  { %v1672_v22 = vadd.f32 %v1640_v18, %v1207_v21  ;;  %v2526_v23 = vpop.f32.mrb[45].mxu0  ;;  %v1674_v26 = vadd.f32 %v1642_v20, %v1253_v24  ;;  %v2532_v27 = vpop.f32.mrb[45].mxu1  ;;  %v1751_v18 = vld [vmem:[#allocation2 + $0xc0] sm:$0xff] }
 0x133   :  { %v1210_v25 = vpop.f32.mrb[46].mxu0  ;;  %v1736_v28 = vld [vmem:[#allocation2 + $0x48] sm:$0xff]  ;;  %v1256_v30 = vpop.f32.mrb[46].mxu1  ;;  %v1738_v33 = vld [vmem:[#allocation2 + $0x58] sm:$0xff] }
 0x134   :  { %1705 = vst.msk [vmem:[#allocation2 + $0x68] sm:$0xff] %vm24_vm3, %v1672_v22  ;;  %v2527_v29 = vpop.f32.mrb[47].mxu0  ;;  %2599 = vmatmul.mubr.msk.f32.gmra.mrb[72].mxu0 %vm24_vm3, %v1736_v28  ;;  %1707 = vst.msk [vmem:[#allocation2 + $0x78] sm:$0xff] %vm24_vm3, %v1674_v26  ;;  %v2533_v32 = vpop.f32.mrb[47].mxu1  ;;  %v1753_v30 = vld [vmem:[#allocation2 + $0xd0] sm:$0xff] }
 0x135   :  { %2601 = vmatprep.mubr.msk.f32.mxu0 %vm24_vm3, %v1737_v31 }
 0x138   :  { %2602 = vmatmul.mubr.msk.f32.gmra.mrb[74].mxu0 %vm24_vm3, %v1738_v33  ;;  %v1755_v33 = vld [vmem:[#allocation2 + $0xe0] sm:$0xff] }
 0x139   :  { %v1299_v37 = vpop.f32.mrb[48].mxu0  ;;  %2604 = vmatprep.mubr.msk.f32.mxu0 %vm24_vm3, %v1739_v35  ;;  %v1345_v40 = vpop.f32.mrb[48].mxu1  ;;  %v1757_v35 = vld [vmem:[#allocation2 + $0xf0] sm:$0xff] }
 0x13a   :  { %v1676_v38 = vadd.f32 %v1644_v34, %v1299_v37  ;;  %v2538_v39 = vpop.f32.mrb[49].mxu0  ;;  %v1678_v42 = vadd.f32 %v1646_v36, %v1345_v40  ;;  %v2544_v43 = vpop.f32.mrb[49].mxu1  ;;  %v3188_v37 = vstv %s3266_s0  ;;  %s2671_s0 = smov [#allocation4]  }
 0x13b   :  { %v1302_v41 = vpop.f32.mrb[50].mxu0  ;;  %v1740_v44 = vld [vmem:[#allocation2 + $0x68] sm:$0xff]  ;;  %v1348_v46 = vpop.f32.mrb[50].mxu1  ;;  %v1742_v49 = vld [vmem:[#allocation2 + $0x78] sm:$0xff]  ;;  %s2217_s16 = sshll.u32 %s2671_s0, 4  ;;  %s2218_s16 = int_to_ptr.vmem [resolvable:$true] %s2217_s16 }
 0x13c   :  { %1709 = vst.msk [vmem:[#allocation2 + $0x88] sm:$0xff] %vm24_vm3, %v1676_v38  ;;  %v2539_v45 = vpop.f32.mrb[51].mxu0  ;;  %2605 = vmatmul.mubr.msk.f32.gmra.mrb[76].mxu0 %vm24_vm3, %v1740_v44  ;;  %1711 = vst.msk [vmem:[#allocation2 + $0x98] sm:$0xff] %vm24_vm3, %v1678_v42  ;;  %v2545_v48 = vpop.f32.mrb[51].mxu1  ;;  %s2645_s17 = scalar_lea.vmem %s2218_s16, 4096  ;;  %p2650_p1 = scmp.lt.s32.totalorder %s2218_s16, %s2218_s16 }
 0x13d   :  { %2607 = vmatprep.mubr.msk.f32.mxu0 %vm24_vm3, %v1741_v47  ;;  %p2646_p0 = scmp.ne.s32.totalorder %s2218_s16, %s2645_s17  ;;  %p2651_p2 = scmp.lt.s32.totalorder %s2645_s17, %s2645_s17 }
 0x13f   :  { %p2652_p3 = por %p2651_p2, %p2650_p1 }
 0x140   :  { %2608 = vmatmul.mubr.msk.f32.gmra.mrb[78].mxu0 %vm24_vm3, %v1742_v49 }
 0x141   :  { %v1391_v52 = vpop.f32.mrb[52].mxu0  ;;  %v1437_v55 = vpop.f32.mrb[52].mxu1  ;;  %p2653_p4 = pnand %p2652_p3, %p2646_p0 }
 0x142   :  { %v1680_v53 = vadd.f32 %v1648_v50, %v1391_v52  ;;  %v2550_v54 = vpop.f32.mrb[53].mxu0  ;;  %v1682_v57 = vadd.f32 %v1650_v51, %v1437_v55  ;;  %v2556_v58 = vpop.f32.mrb[53].mxu1 }
 0x143   :  { %v1394_v56 = vpop.f32.mrb[54].mxu0  ;;  %v1744_v59 = vld [vmem:[#allocation2 + $0x88] sm:$0xff]  ;;  %v1440_v61 = vpop.f32.mrb[54].mxu1  ;;  %v1746_v0 = vld [vmem:[#allocation2 + $0x98] sm:$0xff] }
 0x144   :  { %1713 = vst.msk [vmem:[#allocation2 + $0xa8] sm:$0xff] %vm24_vm3, %v1680_v53  ;;  %v2551_v60 = vpop.f32.mrb[55].mxu0  ;;  %2611 = vmatmul.mubr.msk.f32.vlgmr.msra.gmra.mrb[64].mxu1 %vm24_vm3, %v1744_v59  ;;  %1715 = vst.msk [vmem:[#allocation2 + $0xb8] sm:$0xff] %vm24_vm3, %v1682_v57  ;;  %v2557_v63 = vpop.f32.mrb[55].mxu1 }
 0x145   :  { %2613 = vmatprep.mubr.msk.f32.mxu1 %vm24_vm3, %v1745_v62 }
 0x148   :  { %2614 = vmatmul.mubr.msk.f32.gmra.mrb[66].mxu1 %vm24_vm3, %v1746_v0 }
 0x149   :  { %v1483_v5 = vpop.f32.mrb[56].mxu0  ;;  %2616 = vmatprep.mubr.msk.f32.mxu1 %vm24_vm3, %v1747_v3  ;;  %v1529_v7 = vpop.f32.mrb[56].mxu1 }
 0x14a   :  { %v1684_v2 = vadd.f32 %v1652_v1, %v1483_v5  ;;  %v2562_v6 = vpop.f32.mrb[57].mxu0  ;;  %v1686_v9 = vadd.f32 %v1654_v4, %v1529_v7  ;;  %v2568_v10 = vpop.f32.mrb[57].mxu1 }
 0x14b   :  { %v1486_v8 = vpop.f32.mrb[58].mxu0  ;;  %v1748_v11 = vld [vmem:[#allocation2 + $0xa8] sm:$0xff]  ;;  %v1532_v13 = vpop.f32.mrb[58].mxu1  ;;  %v1750_v16 = vld [vmem:[#allocation2 + $0xb8] sm:$0xff] }
 0x14c   :  { %1717 = vst.msk [vmem:[#allocation2 + $0xc8] sm:$0xff] %vm24_vm3, %v1684_v2  ;;  %v2563_v12 = vpop.f32.mrb[59].mxu0  ;;  %2617 = vmatmul.mubr.msk.f32.gmra.mrb[68].mxu1 %vm24_vm3, %v1748_v11  ;;  %1719 = vst.msk [vmem:[#allocation2 + $0xd8] sm:$0xff] %vm24_vm3, %v1686_v9  ;;  %v2569_v15 = vpop.f32.mrb[59].mxu1 }
 0x14d   :  { %2619 = vmatprep.mubr.msk.f32.mxu1 %vm24_vm3, %v1749_v14 }
 0x150   :  { %2620 = vmatmul.mubr.msk.f32.gmra.mrb[70].mxu1 %vm24_vm3, %v1750_v16 }
 0x151   :  { %v1575_v20 = vpop.f32.mrb[60].mxu0  ;;  %2622 = vmatprep.mubr.msk.f32.mxu1 %vm24_vm3, %v1751_v18  ;;  %v1621_v23 = vpop.f32.mrb[60].mxu1 }
 0x152   :  { %v1688_v21 = vadd.f32 %v1656_v17, %v1575_v20  ;;  %v2574_v22 = vpop.f32.mrb[61].mxu0  ;;  %v1690_v25 = vadd.f32 %v1658_v19, %v1621_v23  ;;  %v2580_v26 = vpop.f32.mrb[61].mxu1 }
 0x153   :  { %v1578_v24 = vpop.f32.mrb[62].mxu0  ;;  %v1752_v27 = vld [vmem:[#allocation2 + $0xc8] sm:$0xff]  ;;  %v1624_v29 = vpop.f32.mrb[62].mxu1  ;;  %v1754_v32 = vld [vmem:[#allocation2 + $0xd8] sm:$0xff] }
 0x154   :  { %1721 = vst.msk [vmem:[#allocation2 + $0xe8] sm:$0xff] %vm24_vm3, %v1688_v21  ;;  %v2575_v28 = vpop.f32.mrb[63].mxu0  ;;  %2623 = vmatmul.mubr.msk.f32.gmra.mrb[72].mxu1 %vm24_vm3, %v1752_v27  ;;  %1723 = vst.msk [vmem:[#allocation2 + $0xf8] sm:$0xff] %vm24_vm3, %v1690_v25  ;;  %v2581_v31 = vpop.f32.mrb[63].mxu1 }
 0x155   :  { %2625 = vmatprep.mubr.msk.f32.mxu1 %vm24_vm3, %v1753_v30 }
 0x158   :  { %2626 = vmatmul.mubr.msk.f32.gmra.mrb[74].mxu1 %vm24_vm3, %v1754_v32 }
 0x159   :  { %2628 = vmatprep.mubr.msk.f32.mxu1 %vm24_vm3, %v1755_v33 }
 0x15b   :  { %v1756_v34 = vld [vmem:[#allocation2 + $0xe8] sm:$0xff]  ;;  %v1758_v36 = vld [vmem:[#allocation2 + $0xf8] sm:$0xff] }
 0x15c   :  { %2629 = vmatmul.mubr.msk.f32.gmra.mrb[76].mxu1 %vm24_vm3, %v1756_v34 }
 0x15d   :  { %2631 = vmatprep.mubr.msk.f32.mxu1 %vm24_vm3, %v1757_v35 }
 0x160   :  { %2632 = vmatmul.mubr.msk.f32.gmra.mrb[78].mxu1 %vm24_vm3, %v1758_v36 }
 0x1f7   :  { %v2588_v38 = vpop.f32.mrb[64].mxu0 }
 0x1f8   :  { %vm2084_vm4 = vcmp.gt.f32.partialorder %v2588_v38, 0.0  ;;  %v2117_v39 = vmul.f32 %v2588_v38, %v3188_v37  ;;  %v1923_v40 = vpop.f32.mrb[65].mxu0 }
 0x1f9   :  { %vm2083_vm5 = vcmp.gt.f32.partialorder %v1923_v40, 0.0  ;;  %v2116_v41 = vmul.f32 %v3188_v37, %v1923_v40 }
 0x1fa   :  { %v2149_v42 = vsel %vm2084_vm4, %v2588_v38, %v2117_v39 }
 0x1fb   :  { %2181 = vst.msk [vmem:[#allocation4 + $0x8] sm:$0xff] %vm24_vm3, %v2149_v42  ;;  %v2148_v43 = vsel %vm2083_vm5, %v1923_v40, %v2116_v41  ;;  %v2591_v44 = vpop.f32.mrb[66].mxu0 }
 0x1fc   :  { %2180 = vst.msk [vmem:[#allocation4] sm:$0xff] %vm24_vm3, %v2148_v43  ;;  %vm2086_vm6 = vcmp.gt.f32.partialorder %v2591_v44, 0.0  ;;  %v2119_v45 = vmul.f32 %v2591_v44, %v3188_v37  ;;  %v1933_v46 = vpop.f32.mrb[67].mxu0 }
 0x1fd   :  { %vm2085_vm7 = vcmp.gt.f32.partialorder %v1933_v46, 0.0  ;;  %v2118_v47 = vmul.f32 %v3188_v37, %v1933_v46 }
 0x1fe   :  { %v2151_v48 = vsel %vm2086_vm6, %v2591_v44, %v2119_v45 }
 0x1ff   :  { %2183 = vst.msk [vmem:[#allocation4 + $0x18] sm:$0xff] %vm24_vm3, %v2151_v48  ;;  %v2150_v49 = vsel %vm2085_vm7, %v1933_v46, %v2118_v47  ;;  %v2594_v50 = vpop.f32.mrb[68].mxu0 }
 0x200   :  { %2182 = vst.msk [vmem:[#allocation4 + $0x10] sm:$0xff] %vm24_vm3, %v2150_v49  ;;  %vm2088_vm8 = vcmp.gt.f32.partialorder %v2594_v50, 0.0  ;;  %v2121_v51 = vmul.f32 %v2594_v50, %v3188_v37  ;;  %v1943_v52 = vpop.f32.mrb[69].mxu0 }
 0x201   :  { %vm2087_vm9 = vcmp.gt.f32.partialorder %v1943_v52, 0.0  ;;  %v2120_v53 = vmul.f32 %v3188_v37, %v1943_v52 }
 0x202   :  { %v2153_v54 = vsel %vm2088_vm8, %v2594_v50, %v2121_v51 }
 0x203   :  { %2185 = vst.msk [vmem:[#allocation4 + $0x28] sm:$0xff] %vm24_vm3, %v2153_v54  ;;  %v2152_v55 = vsel %vm2087_vm9, %v1943_v52, %v2120_v53  ;;  %v2597_v56 = vpop.f32.mrb[70].mxu0 }
 0x204   :  { %2184 = vst.msk [vmem:[#allocation4 + $0x20] sm:$0xff] %vm24_vm3, %v2152_v55  ;;  %vm2090_vm10 = vcmp.gt.f32.partialorder %v2597_v56, 0.0  ;;  %v2123_v57 = vmul.f32 %v2597_v56, %v3188_v37  ;;  %v1953_v58 = vpop.f32.mrb[71].mxu0 }
 0x205   :  { %vm2089_vm11 = vcmp.gt.f32.partialorder %v1953_v58, 0.0  ;;  %v2122_v59 = vmul.f32 %v3188_v37, %v1953_v58 }
 0x206   :  { %v2155_v60 = vsel %vm2090_vm10, %v2597_v56, %v2123_v57 }
 0x207   :  { %2187 = vst.msk [vmem:[#allocation4 + $0x38] sm:$0xff] %vm24_vm3, %v2155_v60  ;;  %v2154_v61 = vsel %vm2089_vm11, %v1953_v58, %v2122_v59  ;;  %v2600_v62 = vpop.f32.mrb[72].mxu0 }
 0x208   :  { %2186 = vst.msk [vmem:[#allocation4 + $0x30] sm:$0xff] %vm24_vm3, %v2154_v61  ;;  %vm2092_vm12 = vcmp.gt.f32.partialorder %v2600_v62, 0.0  ;;  %v2125_v63 = vmul.f32 %v2600_v62, %v3188_v37  ;;  %v1963_v0 = vpop.f32.mrb[73].mxu0 }
 0x209   :  { %vm2091_vm13 = vcmp.gt.f32.partialorder %v1963_v0, 0.0  ;;  %v2124_v1 = vmul.f32 %v3188_v37, %v1963_v0 }
 0x20a   :  { %v2157_v3 = vsel %vm2092_vm12, %v2600_v62, %v2125_v63 }
 0x20b   :  { %2189 = vst.msk [vmem:[#allocation4 + $0x48] sm:$0xff] %vm24_vm3, %v2157_v3  ;;  %v2156_v4 = vsel %vm2091_vm13, %v1963_v0, %v2124_v1  ;;  %v2603_v5 = vpop.f32.mrb[74].mxu0 }
 0x20c   :  { %2188 = vst.msk [vmem:[#allocation4 + $0x40] sm:$0xff] %vm24_vm3, %v2156_v4  ;;  %vm2094_vm14 = vcmp.gt.f32.partialorder %v2603_v5, 0.0  ;;  %v2127_v2 = vmul.f32 %v2603_v5, %v3188_v37  ;;  %v1973_v6 = vpop.f32.mrb[75].mxu0 }
 0x20d   :  { %vm2093_vm15 = vcmp.gt.f32.partialorder %v1973_v6, 0.0  ;;  %v2126_v7 = vmul.f32 %v3188_v37, %v1973_v6 }
 0x20e   :  { %v2159_v8 = vsel %vm2094_vm14, %v2603_v5, %v2127_v2 }
 0x20f   :  { %2191 = vst.msk [vmem:[#allocation4 + $0x58] sm:$0xff] %vm24_vm3, %v2159_v8  ;;  %v2158_v9 = vsel %vm2093_vm15, %v1973_v6, %v2126_v7  ;;  %v2606_v10 = vpop.f32.mrb[76].mxu0 }
 0x210   :  { %2190 = vst.msk [vmem:[#allocation4 + $0x50] sm:$0xff] %vm24_vm3, %v2158_v9  ;;  %vm2096_vm0 = vcmp.gt.f32.partialorder %v2606_v10, 0.0  ;;  %v2129_v11 = vmul.f32 %v2606_v10, %v3188_v37  ;;  %v1983_v12 = vpop.f32.mrb[77].mxu0 }
 0x211   :  { %vm2095_vm1 = vcmp.gt.f32.partialorder %v1983_v12, 0.0  ;;  %v2128_v13 = vmul.f32 %v3188_v37, %v1983_v12 }
 0x212   :  { %v2161_v14 = vsel %vm2096_vm0, %v2606_v10, %v2129_v11 }
 0x213   :  { %2193 = vst.msk [vmem:[#allocation4 + $0x68] sm:$0xff] %vm24_vm3, %v2161_v14  ;;  %v2160_v15 = vsel %vm2095_vm1, %v1983_v12, %v2128_v13  ;;  %v2609_v16 = vpop.f32.mrb[78].mxu0 }
 0x214   :  { %2192 = vst.msk [vmem:[#allocation4 + $0x60] sm:$0xff] %vm24_vm3, %v2160_v15  ;;  %vm2098_vm2 = vcmp.gt.f32.partialorder %v2609_v16, 0.0  ;;  %v2131_v17 = vmul.f32 %v2609_v16, %v3188_v37  ;;  %v1993_v18 = vpop.f32.mrb[79].mxu0 }
 0x215   :  { %vm2097_vm4 = vcmp.gt.f32.partialorder %v1993_v18, 0.0  ;;  %v2130_v19 = vmul.f32 %v3188_v37, %v1993_v18 }
 0x216   :  { %v2163_v20 = vsel %vm2098_vm2, %v2609_v16, %v2131_v17 }
 0x217   :  { %2195 = vst.msk [vmem:[#allocation4 + $0x78] sm:$0xff] %vm24_vm3, %v2163_v20  ;;  %v2162_v21 = vsel %vm2097_vm4, %v1993_v18, %v2130_v19  ;;  %v2612_v22 = vpop.f32.mrb[64].mxu1 }
 0x218   :  { %2194 = vst.msk [vmem:[#allocation4 + $0x70] sm:$0xff] %vm24_vm3, %v2162_v21  ;;  %vm2100_vm5 = vcmp.gt.f32.partialorder %v2612_v22, 0.0  ;;  %v2133_v23 = vmul.f32 %v2612_v22, %v3188_v37  ;;  %v2003_v24 = vpop.f32.mrb[65].mxu1 }
 0x219   :  { %vm2099_vm6 = vcmp.gt.f32.partialorder %v2003_v24, 0.0  ;;  %v2132_v25 = vmul.f32 %v3188_v37, %v2003_v24 }
 0x21a   :  { %v2165_v26 = vsel %vm2100_vm5, %v2612_v22, %v2133_v23 }
 0x21b   :  { %2197 = vst.msk [vmem:[#allocation4 + $0x88] sm:$0xff] %vm24_vm3, %v2165_v26  ;;  %v2164_v27 = vsel %vm2099_vm6, %v2003_v24, %v2132_v25  ;;  %v2615_v28 = vpop.f32.mrb[66].mxu1 }
 0x21c   :  { %2196 = vst.msk [vmem:[#allocation4 + $0x80] sm:$0xff] %vm24_vm3, %v2164_v27  ;;  %vm2102_vm7 = vcmp.gt.f32.partialorder %v2615_v28, 0.0  ;;  %v2135_v29 = vmul.f32 %v2615_v28, %v3188_v37  ;;  %v2013_v30 = vpop.f32.mrb[67].mxu1 }
 0x21d   :  { %vm2101_vm8 = vcmp.gt.f32.partialorder %v2013_v30, 0.0  ;;  %v2134_v31 = vmul.f32 %v3188_v37, %v2013_v30 }
 0x21e   :  { %v2167_v32 = vsel %vm2102_vm7, %v2615_v28, %v2135_v29 }
 0x21f   :  { %2199 = vst.msk [vmem:[#allocation4 + $0x98] sm:$0xff] %vm24_vm3, %v2167_v32  ;;  %v2166_v33 = vsel %vm2101_vm8, %v2013_v30, %v2134_v31  ;;  %v2618_v34 = vpop.f32.mrb[68].mxu1 }
 0x220   :  { %2198 = vst.msk [vmem:[#allocation4 + $0x90] sm:$0xff] %vm24_vm3, %v2166_v33  ;;  %vm2104_vm9 = vcmp.gt.f32.partialorder %v2618_v34, 0.0  ;;  %v2137_v35 = vmul.f32 %v2618_v34, %v3188_v37  ;;  %v2023_v36 = vpop.f32.mrb[69].mxu1 }
 0x221   :  { %vm2103_vm10 = vcmp.gt.f32.partialorder %v2023_v36, 0.0  ;;  %v2136_v38 = vmul.f32 %v3188_v37, %v2023_v36 }
 0x222   :  { %v2169_v39 = vsel %vm2104_vm9, %v2618_v34, %v2137_v35 }
 0x223   :  { %2201 = vst.msk [vmem:[#allocation4 + $0xa8] sm:$0xff] %vm24_vm3, %v2169_v39  ;;  %v2168_v40 = vsel %vm2103_vm10, %v2023_v36, %v2136_v38  ;;  %v2621_v41 = vpop.f32.mrb[70].mxu1 }
 0x224   :  { %2200 = vst.msk [vmem:[#allocation4 + $0xa0] sm:$0xff] %vm24_vm3, %v2168_v40  ;;  %vm2106_vm11 = vcmp.gt.f32.partialorder %v2621_v41, 0.0  ;;  %v2139_v42 = vmul.f32 %v2621_v41, %v3188_v37  ;;  %v2033_v43 = vpop.f32.mrb[71].mxu1 }
 0x225   :  { %vm2105_vm12 = vcmp.gt.f32.partialorder %v2033_v43, 0.0  ;;  %v2138_v44 = vmul.f32 %v3188_v37, %v2033_v43 }
 0x226   :  { %v2171_v45 = vsel %vm2106_vm11, %v2621_v41, %v2139_v42 }
 0x227   :  { %2203 = vst.msk [vmem:[#allocation4 + $0xb8] sm:$0xff] %vm24_vm3, %v2171_v45  ;;  %v2170_v46 = vsel %vm2105_vm12, %v2033_v43, %v2138_v44  ;;  %v2624_v47 = vpop.f32.mrb[72].mxu1 }
 0x228   :  { %2202 = vst.msk [vmem:[#allocation4 + $0xb0] sm:$0xff] %vm24_vm3, %v2170_v46  ;;  %vm2108_vm13 = vcmp.gt.f32.partialorder %v2624_v47, 0.0  ;;  %v2141_v48 = vmul.f32 %v2624_v47, %v3188_v37  ;;  %v2043_v49 = vpop.f32.mrb[73].mxu1 }
 0x229   :  { %vm2107_vm14 = vcmp.gt.f32.partialorder %v2043_v49, 0.0  ;;  %v2140_v50 = vmul.f32 %v3188_v37, %v2043_v49 }
 0x22a   :  { %v2173_v51 = vsel %vm2108_vm13, %v2624_v47, %v2141_v48 }
 0x22b   :  { %2205 = vst.msk [vmem:[#allocation4 + $0xc8] sm:$0xff] %vm24_vm3, %v2173_v51  ;;  %v2172_v52 = vsel %vm2107_vm14, %v2043_v49, %v2140_v50  ;;  %v2627_v53 = vpop.f32.mrb[74].mxu1 }
 0x22c   :  { %2204 = vst.msk [vmem:[#allocation4 + $0xc0] sm:$0xff] %vm24_vm3, %v2172_v52  ;;  %vm2110_vm15 = vcmp.gt.f32.partialorder %v2627_v53, 0.0  ;;  %v2143_v54 = vmul.f32 %v2627_v53, %v3188_v37  ;;  %v2053_v55 = vpop.f32.mrb[75].mxu1 }
 0x22d   :  { %vm2109_vm0 = vcmp.gt.f32.partialorder %v2053_v55, 0.0  ;;  %v2142_v56 = vmul.f32 %v3188_v37, %v2053_v55 }
 0x22e   :  { %v2175_v57 = vsel %vm2110_vm15, %v2627_v53, %v2143_v54 }
 0x22f   :  { %2207 = vst.msk [vmem:[#allocation4 + $0xd8] sm:$0xff] %vm24_vm3, %v2175_v57  ;;  %v2174_v58 = vsel %vm2109_vm0, %v2053_v55, %v2142_v56  ;;  %v2630_v59 = vpop.f32.mrb[76].mxu1 }
 0x230   :  { %2206 = vst.msk [vmem:[#allocation4 + $0xd0] sm:$0xff] %vm24_vm3, %v2174_v58  ;;  %vm2112_vm1 = vcmp.gt.f32.partialorder %v2630_v59, 0.0  ;;  %v2145_v60 = vmul.f32 %v2630_v59, %v3188_v37  ;;  %v2063_v61 = vpop.f32.mrb[77].mxu1 }
 0x231   :  { %vm2111_vm2 = vcmp.gt.f32.partialorder %v2063_v61, 0.0  ;;  %v2144_v62 = vmul.f32 %v3188_v37, %v2063_v61 }
 0x232   :  { %v2177_v63 = vsel %vm2112_vm1, %v2630_v59, %v2145_v60 }
 0x233   :  { %2209 = vst.msk [vmem:[#allocation4 + $0xe8] sm:$0xff] %vm24_vm3, %v2177_v63  ;;  %v2176_v0 = vsel %vm2111_vm2, %v2063_v61, %v2144_v62  ;;  %v2633_v1 = vpop.f32.mrb[78].mxu1 }
 0x234   :  { %2208 = vst.msk [vmem:[#allocation4 + $0xe0] sm:$0xff] %vm24_vm3, %v2176_v0  ;;  %vm2114_vm4 = vcmp.gt.f32.partialorder %v2633_v1, 0.0  ;;  %v2147_v3 = vmul.f32 %v2633_v1, %v3188_v37  ;;  %v2073_v4 = vpop.f32.mrb[79].mxu1 }
 0x235   :  { %vm2113_vm5 = vcmp.gt.f32.partialorder %v2073_v4, 0.0  ;;  %v2146_v5 = vmul.f32 %v3188_v37, %v2073_v4 }
 0x236   :  { %v2179_v2 = vsel %vm2114_vm4, %v2633_v1, %v2147_v3 }
 0x237   :  { %2211 = vst.msk [vmem:[#allocation4 + $0xf8] sm:$0xff] %vm24_vm3, %v2179_v2  ;;  %v2178_v6 = vsel %vm2113_vm5, %v2073_v4, %v2146_v5 }
 0x238   :  { %2210 = vst.msk [vmem:[#allocation4 + $0xf0] sm:$0xff] %vm24_vm3, %v2178_v6 }
 0x239   :  { %2656 = shalt.err (!%p2653_p4)
}
 0x23a   :  { %s2657_s20 = scalar_lea.hbm %s3270_s4, 4096 }
 0x23b   :  { %p2658_p5 = scmp.ne.s32.totalorder %s3270_s4, %s2657_s20  ;;  %p2661_p6 = scmp.lt.u32.totalorder %s2657_s20, %s3270_s4 }
 0x23d   :  { %p2663_p7 = pnand %p2661_p6, %p2658_p5 }
 0x23f   :  { %2666 = shalt.err (!%p2663_p7)
}
 0x240   :  { %s2672_s25 = smov 128   ;;  %s2673_s26 = smov 8  }
 0x241   :  { %2223 = dma.vmem_to_hbm [thread:$0]  %s2218_s16, 4096, %s3270_s4, [#allocation5], %s2672_s25, %s2672_s25, %s2673_s26  }
 0x242   :  { %2667 = dma.done.wait [#allocation5], 4096  }
 0x243   :  { %2668 = vsyncadd [#allocation5], 4294963200 }
 0x244   :  { %2227 = vsyncpa [#allocation5], 1 }

</bundles_post_ra>
